<compile_context>
chip_gen: v6e
topology: v6e:2x2x1
jax: 0.10.0
libtpu: 0.0.40
codegen_flags: <defaults>
</compile_context>

<pallas_src>
import functools

import jax
import jax.numpy as jnp
from jax import lax
from jax.experimental import pallas as pl
from jax.experimental.pallas import tpu as pltpu


def _round_up(x, m):
    return (x + m - 1) // m * m


def _conv_taps(x_ref, w_ref, *, kh, kw, h_out, w_out, cin):
    """In-kernel im2col: conv as kh*kw accumulating sub-matmuls on the MXU.

    x_ref block: (1, H_pad, W_pad, Cin_p)   one spatially padded NHWC image
    w_ref block: (kh*kw, Cin_p, Cout_p)
    returns:     (h_out * w_out, Cout_p) float32
    """
    xb = x_ref[0]          # (H_pad, W_pad, Cin_p)
    wb = w_ref[...]        # (kh*kw, Cin_p, Cout_p)
    acc = None
    t = 0
    for dy in range(kh):
        for dx in range(kw):
            lhs = xb[dy:dy + h_out, dx:dx + w_out, :].reshape(h_out * w_out, cin)
            part = jnp.dot(lhs, wb[t], preferred_element_type=jnp.float32)
            acc = part if acc is None else acc + part
            t += 1
    return acc


def _conv_stats_kernel(x_ref, w_ref, stats_ref, *, kh, kw, h_out, w_out, cin):
    """Pass 1: conv (no bias) + per-image BN partial statistics.

    Emits per-grid-step partials (mean_i, M2_i) instead of a revisited
    accumulator, so the grid axis stays "parallel" (v7x megacore friendly).
    """
    y = _conv_taps(x_ref, w_ref, kh=kh, kw=kw, h_out=h_out, w_out=w_out, cin=cin)
    m_img = h_out * w_out
    mean = jnp.sum(y, axis=0, keepdims=True) * (1.0 / m_img)     # (1, Cout_p)
    d = y - mean
    m2 = jnp.sum(d * d, axis=0, keepdims=True)                   # (1, Cout_p)
    stats_ref[0, 0:1, :] = mean
    stats_ref[0, 1:2, :] = m2


def _conv_bn_relu_kernel(x_ref, w_ref, scale_ref, shift_ref, o_ref, *,
                         kh, kw, h_out, w_out, cin):
    """Pass 2: recompute the (mem-bound) conv, fused BN affine + ReLU.

    Output block is a lane-dense flat (M_img, Cout_p) slab (Cout_p % 128 == 0)."""
    y = _conv_taps(x_ref, w_ref, kh=kh, kw=kw, h_out=h_out, w_out=w_out, cin=cin)
    o_ref[0] = jnp.maximum(y * scale_ref[...] + shift_ref[...], 0.0)


def conv_block_forward(x_nchw, w, b, gamma, beta, *, stride=1, padding=1, eps=1e-5):
    del b  # Conv bias is exactly cancelled by training-mode BatchNorm (batch stats).
    N, Cin, H, W = x_nchw.shape
    Cout, Cin_w, kh, kw = w.shape
    assert Cin_w == Cin and stride == 1

    H_out = H + 2 * padding - kh + 1
    W_out = W + 2 * padding - kw + 1
    M_img = H_out * W_out
    M_total = N * M_img

    Cin_p = _round_up(Cin, 8)        # sublane-friendly K per tap
    Cout_p = _round_up(Cout, 128)    # lane-dense output / MXU-friendly N dim

    # ---- glue: NCHW -> NHWC f32, spatial + channel padding ----
    x = jnp.transpose(x_nchw, (0, 2, 3, 1)).astype(jnp.float32)
    x_pad = jnp.pad(x, ((0, 0), (padding, padding), (padding, padding),
                        (0, Cin_p - Cin)))
    H_pad, W_pad = H + 2 * padding, W + 2 * padding

    # PyTorch weight (Cout, Cin, kh, kw) -> (kh*kw, Cin_p, Cout_p)
    w_taps = jnp.transpose(w.astype(jnp.float32), (2, 3, 1, 0)).reshape(
        kh * kw, Cin, Cout)
    w_taps = jnp.pad(w_taps, ((0, 0), (0, Cin_p - Cin), (0, Cout_p - Cout)))

    # ---- VMEM budget (double-buffered blocks + in-kernel y temporary) ----
    f32b = 4
    x_blk = H_pad * W_pad * Cin_p * f32b
    w_blk = kh * kw * Cin_p * Cout_p * f32b
    o_blk = M_img * Cout_p * f32b
    y_tmp = M_img * Cout_p * f32b
    need = 2 * (x_blk + o_blk) + 2 * w_blk + 2 * y_tmp + (2 << 20)
    vmem_limit = int(min(max(need, 16 << 20), 48 << 20))  # 48 MiB cap: safe on v7x
    # TODO(synk): for very large images (need > ~48 MiB) tile H_out with a manually
    # DMA'd halo slab (pl.ANY + make_async_copy) instead of one whole image per step.

    grid = (N,)
    x_spec = pl.BlockSpec((1, H_pad, W_pad, Cin_p), lambda i: (i, 0, 0, 0))
    w_spec = pl.BlockSpec((kh * kw, Cin_p, Cout_p), lambda i: (0, 0, 0))
    cparams = pltpu.CompilerParams(dimension_semantics=("parallel",),
                                   vmem_limit_bytes=vmem_limit)

    # ---- Pallas kernel 1: conv + per-image partial BN stats ----
    stats = pl.pallas_call(
        functools.partial(_conv_stats_kernel, kh=kh, kw=kw,
                          h_out=H_out, w_out=W_out, cin=Cin_p),
        out_shape=jax.ShapeDtypeStruct((N, 2, Cout_p), jnp.float32),
        grid_spec=pltpu.PrefetchScalarGridSpec(
            num_scalar_prefetch=0,
            grid=grid,
            in_specs=[x_spec, w_spec],
            out_specs=pl.BlockSpec((1, 2, Cout_p), lambda i: (i, 0, 0)),
        ),
        compiler_params=cparams,
    )(x_pad, w_taps)

    # ---- glue: combine per-image (mean, M2) -> batch mean/var (Chan's formula),
    #      then BN scale/shift (PyTorch training-mode BN: biased var, eps) ----
    means = stats[:, 0, :]                                   # (N, Cout_p)
    m2s = stats[:, 1, :]                                     # (N, Cout_p)
    mean = jnp.mean(means, axis=0)                           # (Cout_p,)
    var = (jnp.sum(m2s, axis=0)
           + M_img * jnp.sum((means - mean[None, :]) ** 2, axis=0)) / M_total
    gamma_p = jnp.pad(gamma.astype(jnp.float32), (0, Cout_p - Cout))
    beta_p = jnp.pad(beta.astype(jnp.float32), (0, Cout_p - Cout))
    scale = gamma_p * lax.rsqrt(var + eps)
    shift = beta_p - mean * scale

    # ---- Pallas kernel 2: conv (recomputed) + BN affine + ReLU, fused ----
    out_flat = pl.pallas_call(
        functools.partial(_conv_bn_relu_kernel, kh=kh, kw=kw,
                          h_out=H_out, w_out=W_out, cin=Cin_p),
        out_shape=jax.ShapeDtypeStruct((N, M_img, Cout_p), jnp.float32),
        grid_spec=pltpu.PrefetchScalarGridSpec(
            num_scalar_prefetch=0,
            grid=grid,
            in_specs=[x_spec, w_spec,
                      pl.BlockSpec((1, Cout_p), lambda i: (0, 0)),
                      pl.BlockSpec((1, Cout_p), lambda i: (0, 0))],
            out_specs=pl.BlockSpec((1, M_img, Cout_p), lambda i: (i, 0, 0)),
        ),
        compiler_params=cparams,
    )(x_pad, w_taps, scale.reshape(1, Cout_p), shift.reshape(1, Cout_p))

    # ---- glue: strip channel padding, back to NCHW ----
    out = out_flat[:, :, :Cout].reshape(N, H_out, W_out, Cout)
    return jnp.transpose(out, (0, 3, 1, 2))


def _reference(x_nchw, w, b, gamma, beta, eps=1e-5):
    """Pure-JAX reference matching PyTorch Conv2d + BatchNorm2d(train) + ReLU."""
    y = lax.conv_general_dilated(
        x_nchw.astype(jnp.float32), w.astype(jnp.float32),
        window_strides=(1, 1), padding=((1, 1), (1, 1)),
        dimension_numbers=("NCHW", "OIHW", "NCHW"))
    y = y + b.reshape(1, -1, 1, 1)
    mean = jnp.mean(y, axis=(0, 2, 3), keepdims=True)
    var = jnp.mean((y - mean) ** 2, axis=(0, 2, 3), keepdims=True)
    yn = (y - mean) / jnp.sqrt(var + eps)
    yn = yn * gamma.reshape(1, -1, 1, 1) + beta.reshape(1, -1, 1, 1)
    return jnp.maximum(yn, 0.0)


if __name__ == "__main__":
    # Small shapes consistent with the module's forward: NCHW input.
    N, Cin, H, W = 2, 4, 16, 16
    Cout, k = 8, 3

    key = jax.random.PRNGKey(0)
    kx, kw_, kb, kg, kbeta = jax.random.split(key, 5)

    x = jax.random.normal(kx, (N, Cin, H, W), dtype=jnp.float32)
    # Deterministic synthetic params (shapes match nn.Conv2d / nn.BatchNorm2d).
    fan_in = Cin * k * k
    bound = 1.0 / (fan_in ** 0.5)
    w = jax.random.uniform(kw_, (Cout, Cin, k, k), minval=-bound, maxval=bound,
                           dtype=jnp.float32)
    b = jax.random.uniform(kb, (Cout,), minval=-bound, maxval=bound,
                           dtype=jnp.float32)
    gamma = jax.random.uniform(kg, (Cout,), minval=0.5, maxval=1.5,
                               dtype=jnp.float32)
    beta = 0.1 * jax.random.normal(kbeta, (Cout,), dtype=jnp.float32)

    out = conv_block_forward(x, w, b, gamma, beta)
    out = jax.block_until_ready(out)

    ref = jax.block_until_ready(_reference(x, w, b, gamma, beta))
    assert out.shape == (N, Cout, H, W)
    assert jnp.allclose(out, ref, atol=2e-4, rtol=2e-4), \
        float(jnp.max(jnp.abs(out - ref)))

    print("KERNEL_OK")
</pallas_src>

<mosaic_0001>
module attributes {stable_mosaic.version = 11 : i64} {
  func.func @_conv_stats_kernel(%arg0: i32, %arg1: memref<1x18x18x8xf32, #tpu.memory_space<vmem>>, %arg2: memref<9x8x128xf32, #tpu.memory_space<vmem>>, %arg3: memref<1x2x128xf32, #tpu.memory_space<vmem>>) attributes {dimension_semantics = [#tpu.dimension_semantics<parallel>], iteration_bounds = array<i64: 2>, scalar_prefetch = 0 : i64, scratch_operands = 0 : i64, tpu.core_type = #tpu.core_type<tc>, window_params = [{transform_indices = @transform_0, window_bounds = array<i64: 1, 18, 18, 8>}, {pipeline_mode = #tpu.pipeline_mode<synchronous>, transform_indices = @transform_1, window_bounds = array<i64: 9, 8, 128>}, {transform_indices = @transform_2, window_bounds = array<i64: 1, 2, 128>}]} {
    %c0 = arith.constant 0 : index
    %c0_0 = arith.constant 0 : index
    %c0_1 = arith.constant 0 : index
    %c0_2 = arith.constant 0 : index
    %0 = vector.load %arg1[%c0, %c0_0, %c0_1, %c0_2] : memref<1x18x18x8xf32, #tpu.memory_space<vmem>>, vector<1x18x18x8xf32>
    %1 = vector.shape_cast %0 : vector<1x18x18x8xf32> to vector<18x18x8xf32>
    %c0_3 = arith.constant 0 : index
    %c0_4 = arith.constant 0 : index
    %c0_5 = arith.constant 0 : index
    %2 = vector.load %arg2[%c0_3, %c0_4, %c0_5] : memref<9x8x128xf32, #tpu.memory_space<vmem>>, vector<9x8x128xf32>
    %3 = vector.extract_strided_slice %1 {offsets = [0, 0, 0], sizes = [16, 16, 8], strides = [1, 1, 1]} : vector<18x18x8xf32> to vector<16x16x8xf32>
    %4 = vector.shape_cast %3 : vector<16x16x8xf32> to vector<256x8xf32>
    %5 = vector.extract_strided_slice %2 {offsets = [0, 0, 0], sizes = [1, 8, 128], strides = [1, 1, 1]} : vector<9x8x128xf32> to vector<1x8x128xf32>
    %6 = vector.shape_cast %5 : vector<1x8x128xf32> to vector<8x128xf32>
    %cst = arith.constant dense<0.000000e+00> : vector<256x128xf32>
    %7 = tpu.matmul %4, %6, %cst {dimension_numbers = #tpu.dot_dimension_numbers<[1], [0], [0], [1], [0, 0, 1, 1], [], []>} : vector<256x8xf32>, vector<8x128xf32>, vector<256x128xf32> -> vector<256x128xf32>
    %8 = vector.extract_strided_slice %1 {offsets = [0, 1, 0], sizes = [16, 16, 8], strides = [1, 1, 1]} : vector<18x18x8xf32> to vector<16x16x8xf32>
    %9 = vector.shape_cast %8 : vector<16x16x8xf32> to vector<256x8xf32>
    %10 = vector.extract_strided_slice %2 {offsets = [1, 0, 0], sizes = [1, 8, 128], strides = [1, 1, 1]} : vector<9x8x128xf32> to vector<1x8x128xf32>
    %11 = vector.shape_cast %10 : vector<1x8x128xf32> to vector<8x128xf32>
    %cst_6 = arith.constant dense<0.000000e+00> : vector<256x128xf32>
    %12 = tpu.matmul %9, %11, %cst_6 {dimension_numbers = #tpu.dot_dimension_numbers<[1], [0], [0], [1], [0, 0, 1, 1], [], []>} : vector<256x8xf32>, vector<8x128xf32>, vector<256x128xf32> -> vector<256x128xf32>
    %13 = arith.addf %7, %12 : vector<256x128xf32>
    %14 = vector.extract_strided_slice %1 {offsets = [0, 2, 0], sizes = [16, 16, 8], strides = [1, 1, 1]} : vector<18x18x8xf32> to vector<16x16x8xf32>
    %15 = vector.shape_cast %14 : vector<16x16x8xf32> to vector<256x8xf32>
    %16 = vector.extract_strided_slice %2 {offsets = [2, 0, 0], sizes = [1, 8, 128], strides = [1, 1, 1]} : vector<9x8x128xf32> to vector<1x8x128xf32>
    %17 = vector.shape_cast %16 : vector<1x8x128xf32> to vector<8x128xf32>
    %cst_7 = arith.constant dense<0.000000e+00> : vector<256x128xf32>
    %18 = tpu.matmul %15, %17, %cst_7 {dimension_numbers = #tpu.dot_dimension_numbers<[1], [0], [0], [1], [0, 0, 1, 1], [], []>} : vector<256x8xf32>, vector<8x128xf32>, vector<256x128xf32> -> vector<256x128xf32>
    %19 = arith.addf %13, %18 : vector<256x128xf32>
    %20 = vector.extract_strided_slice %1 {offsets = [1, 0, 0], sizes = [16, 16, 8], strides = [1, 1, 1]} : vector<18x18x8xf32> to vector<16x16x8xf32>
    %21 = vector.shape_cast %20 : vector<16x16x8xf32> to vector<256x8xf32>
    %22 = vector.extract_strided_slice %2 {offsets = [3, 0, 0], sizes = [1, 8, 128], strides = [1, 1, 1]} : vector<9x8x128xf32> to vector<1x8x128xf32>
    %23 = vector.shape_cast %22 : vector<1x8x128xf32> to vector<8x128xf32>
    %cst_8 = arith.constant dense<0.000000e+00> : vector<256x128xf32>
    %24 = tpu.matmul %21, %23, %cst_8 {dimension_numbers = #tpu.dot_dimension_numbers<[1], [0], [0], [1], [0, 0, 1, 1], [], []>} : vector<256x8xf32>, vector<8x128xf32>, vector<256x128xf32> -> vector<256x128xf32>
    %25 = arith.addf %19, %24 : vector<256x128xf32>
    %26 = vector.extract_strided_slice %1 {offsets = [1, 1, 0], sizes = [16, 16, 8], strides = [1, 1, 1]} : vector<18x18x8xf32> to vector<16x16x8xf32>
    %27 = vector.shape_cast %26 : vector<16x16x8xf32> to vector<256x8xf32>
    %28 = vector.extract_strided_slice %2 {offsets = [4, 0, 0], sizes = [1, 8, 128], strides = [1, 1, 1]} : vector<9x8x128xf32> to vector<1x8x128xf32>
    %29 = vector.shape_cast %28 : vector<1x8x128xf32> to vector<8x128xf32>
    %cst_9 = arith.constant dense<0.000000e+00> : vector<256x128xf32>
    %30 = tpu.matmul %27, %29, %cst_9 {dimension_numbers = #tpu.dot_dimension_numbers<[1], [0], [0], [1], [0, 0, 1, 1], [], []>} : vector<256x8xf32>, vector<8x128xf32>, vector<256x128xf32> -> vector<256x128xf32>
    %31 = arith.addf %25, %30 : vector<256x128xf32>
    %32 = vector.extract_strided_slice %1 {offsets = [1, 2, 0], sizes = [16, 16, 8], strides = [1, 1, 1]} : vector<18x18x8xf32> to vector<16x16x8xf32>
    %33 = vector.shape_cast %32 : vector<16x16x8xf32> to vector<256x8xf32>
    %34 = vector.extract_strided_slice %2 {offsets = [5, 0, 0], sizes = [1, 8, 128], strides = [1, 1, 1]} : vector<9x8x128xf32> to vector<1x8x128xf32>
    %35 = vector.shape_cast %34 : vector<1x8x128xf32> to vector<8x128xf32>
    %cst_10 = arith.constant dense<0.000000e+00> : vector<256x128xf32>
    %36 = tpu.matmul %33, %35, %cst_10 {dimension_numbers = #tpu.dot_dimension_numbers<[1], [0], [0], [1], [0, 0, 1, 1], [], []>} : vector<256x8xf32>, vector<8x128xf32>, vector<256x128xf32> -> vector<256x128xf32>
    %37 = arith.addf %31, %36 : vector<256x128xf32>
    %38 = vector.extract_strided_slice %1 {offsets = [2, 0, 0], sizes = [16, 16, 8], strides = [1, 1, 1]} : vector<18x18x8xf32> to vector<16x16x8xf32>
    %39 = vector.shape_cast %38 : vector<16x16x8xf32> to vector<256x8xf32>
    %40 = vector.extract_strided_slice %2 {offsets = [6, 0, 0], sizes = [1, 8, 128], strides = [1, 1, 1]} : vector<9x8x128xf32> to vector<1x8x128xf32>
    %41 = vector.shape_cast %40 : vector<1x8x128xf32> to vector<8x128xf32>
    %cst_11 = arith.constant dense<0.000000e+00> : vector<256x128xf32>
    %42 = tpu.matmul %39, %41, %cst_11 {dimension_numbers = #tpu.dot_dimension_numbers<[1], [0], [0], [1], [0, 0, 1, 1], [], []>} : vector<256x8xf32>, vector<8x128xf32>, vector<256x128xf32> -> vector<256x128xf32>
    %43 = arith.addf %37, %42 : vector<256x128xf32>
    %44 = vector.extract_strided_slice %1 {offsets = [2, 1, 0], sizes = [16, 16, 8], strides = [1, 1, 1]} : vector<18x18x8xf32> to vector<16x16x8xf32>
    %45 = vector.shape_cast %44 : vector<16x16x8xf32> to vector<256x8xf32>
    %46 = vector.extract_strided_slice %2 {offsets = [7, 0, 0], sizes = [1, 8, 128], strides = [1, 1, 1]} : vector<9x8x128xf32> to vector<1x8x128xf32>
    %47 = vector.shape_cast %46 : vector<1x8x128xf32> to vector<8x128xf32>
    %cst_12 = arith.constant dense<0.000000e+00> : vector<256x128xf32>
    %48 = tpu.matmul %45, %47, %cst_12 {dimension_numbers = #tpu.dot_dimension_numbers<[1], [0], [0], [1], [0, 0, 1, 1], [], []>} : vector<256x8xf32>, vector<8x128xf32>, vector<256x128xf32> -> vector<256x128xf32>
    %49 = arith.addf %43, %48 : vector<256x128xf32>
    %50 = vector.extract_strided_slice %1 {offsets = [2, 2, 0], sizes = [16, 16, 8], strides = [1, 1, 1]} : vector<18x18x8xf32> to vector<16x16x8xf32>
    %51 = vector.shape_cast %50 : vector<16x16x8xf32> to vector<256x8xf32>
    %52 = vector.extract_strided_slice %2 {offsets = [8, 0, 0], sizes = [1, 8, 128], strides = [1, 1, 1]} : vector<9x8x128xf32> to vector<1x8x128xf32>
    %53 = vector.shape_cast %52 : vector<1x8x128xf32> to vector<8x128xf32>
    %cst_13 = arith.constant dense<0.000000e+00> : vector<256x128xf32>
    %54 = tpu.matmul %51, %53, %cst_13 {dimension_numbers = #tpu.dot_dimension_numbers<[1], [0], [0], [1], [0, 0, 1, 1], [], []>} : vector<256x8xf32>, vector<8x128xf32>, vector<256x128xf32> -> vector<256x128xf32>
    %55 = arith.addf %49, %54 : vector<256x128xf32>
    %cst_14 = arith.constant dense<0.000000e+00> : vector<128xf32>
    %56 = vector.multi_reduction <add>, %55, %cst_14 [0] : vector<256x128xf32> to vector<128xf32>
    %57 = vector.shape_cast %56 : vector<128xf32> to vector<1x128xf32>
    %cst_15 = arith.constant 3.906250e-03 : f32
    %58 = vector.broadcast %cst_15 : f32 to vector<1x128xf32>
    %59 = arith.mulf %57, %58 : vector<1x128xf32>
    %60 = vector.broadcast %59 : vector<1x128xf32> to vector<256x128xf32>
    %61 = arith.subf %55, %60 : vector<256x128xf32>
    %62 = arith.mulf %61, %61 : vector<256x128xf32>
    %cst_16 = arith.constant dense<0.000000e+00> : vector<128xf32>
    %63 = vector.multi_reduction <add>, %62, %cst_16 [0] : vector<256x128xf32> to vector<128xf32>
    %64 = vector.shape_cast %63 : vector<128xf32> to vector<1x128xf32>
    %c0_17 = arith.constant 0 : index
    %c0_18 = arith.constant 0 : index
    %c0_19 = arith.constant 0 : index
    %65 = vector.load %arg3[%c0_17, %c0_18, %c0_19] : memref<1x2x128xf32, #tpu.memory_space<vmem>>, vector<1x1x128xf32>
    %66 = vector.shape_cast %65 : vector<1x1x128xf32> to vector<1x128xf32>
    %67 = vector.shape_cast %59 : vector<1x128xf32> to vector<1x1x128xf32>
    tpu.vector_store %arg3[%c0_17, %c0_18, %c0_19], %67 {strides = array<i32>} : memref<1x2x128xf32, #tpu.memory_space<vmem>>, vector<1x1x128xf32>,
    %c0_20 = arith.constant 0 : index
    %c1 = arith.constant 1 : index
    %c0_21 = arith.constant 0 : index
    %68 = vector.load %arg3[%c0_20, %c1, %c0_21] : memref<1x2x128xf32, #tpu.memory_space<vmem>>, vector<1x1x128xf32>
    %69 = vector.shape_cast %68 : vector<1x1x128xf32> to vector<1x128xf32>
    %70 = vector.shape_cast %64 : vector<1x128xf32> to vector<1x1x128xf32>
    tpu.vector_store %arg3[%c0_20, %c1, %c0_21], %70 {strides = array<i32>} : memref<1x2x128xf32, #tpu.memory_space<vmem>>, vector<1x1x128xf32>,
    return
  }
  func.func @transform_0(%arg0: i32) -> (i32, i32, i32, i32) {
    %c0_i32 = arith.constant 0 : i32
    %c0_i32_0 = arith.constant 0 : i32
    %c0_i32_1 = arith.constant 0 : i32
    %c0_i32_2 = arith.constant 0 : i32
    return %arg0, %c0_i32, %c0_i32_0, %c0_i32_1 : i32, i32, i32, i32
  }
  func.func @transform_1(%arg0: i32) -> (i32, i32, i32) {
    %c0_i32 = arith.constant 0 : i32
    %c0_i32_0 = arith.constant 0 : i32
    %c0_i32_1 = arith.constant 0 : i32
    %c0_i32_2 = arith.constant 0 : i32
    return %c0_i32, %c0_i32_0, %c0_i32_1 : i32, i32, i32
  }
  func.func @transform_2(%arg0: i32) -> (i32, i32, i32) {
    %c0_i32 = arith.constant 0 : i32
    %c0_i32_0 = arith.constant 0 : i32
    %c0_i32_1 = arith.constant 0 : i32
    return %arg0, %c0_i32, %c0_i32_0 : i32, i32, i32
  }
}

</mosaic_0001>

<bundles_post_ra>
// kernel: tpu_custom_call.1
= control target key start
LH: loop header
LB: loop body
LE: loop exit
PB: predicated region body
PF: predicated region fallthrough
CT: control target
= control target key end

     0   :  { %7 = vsyncpa [#allocation3], 0  ;;  %s6029_s0 = inlined_call_operand.vmem [shape: f32[2,18,18,8], index: 0, kind: input, shape index: {}]   ;;  %s6030_s1 = inlined_call_operand.vmem [shape: f32[9,8,128], index: 1, kind: input, shape index: {}]   ;;  %s6031_s2 = inlined_call_operand.hbm [shape: f32[2,2,128], index: 2, kind: output, shape index: {}]  }
   0x1   :  { %9 = vsyncpa [#allocation3 + $0x1], 0  ;;  %s4286_s9 = smov 0   ;;  %s4288_s10 = smov 0  }
   0x2   :  { %s4290_s11 = smov 0   ;;  %s4292_s12 = smov 0  }
   0x3 LB: > { %s4307_s13 = sadd.s32 4294967295, %s4268_s12   ;;  %s3121_s14 = sadd.s32 4294967294, %s4268_s12   ;;  %s4268_s12 = sphi %s4292_s12, %s6277_s12   ;;  %s4264_s11 = sphi %s4290_s11, %s6276_s11   ;;  %s4260_s10 = sphi %s4288_s10, %s6275_s10   ;;  %s4256_s9 = sphi %s4286_s9, %s6274_s9  }
   0x4   : > { %s4311_s15 = sadd.s32 1, %s4268_s12   ;;  %s69_s16 = sadd.s32 1, %s4264_s11 }
   0x5   : > { %s66_s17 = ssub.s32 %s4268_s12, %s4311_s15  ;;  %p79_p0 = scmp.ne.s32.totalorder %s4264_s11, %s4260_s10 }
   0x6   : > { %p67_p1 = scmp.eq.s32.totalorder %s66_s17, 0  ;;  %p80_p2 = scmp.eq.s32.totalorder %s4307_s13, 1 }
   0x7   : > { %p85_p3 = scmp.ne.s32.totalorder %s4260_s10, %s4256_s9  ;;  %p86_p4 = scmp.eq.s32.totalorder %s3121_s14, 1 }
   0x8   : > { %s4322_s18 = scalar_select %p67_p1, %s4264_s11, %s69_s16  }
   0x9   : > { %p4324_p5 = por %p80_p2, %p79_p0  ;;  %p4328_p6 = por %p86_p4, %p85_p3 }
   0xa   : > { %p3124_p7 = scmp.ge.s32.totalorder %s4268_s12, 1  ;;  %p115_p8 = scmp.lt.s32.totalorder %s4268_s12, 3 }
   0xc   : > { %p116_p9 = pnand %p3124_p7, %p115_p8 }
   0xe   : > { %119 = sbr.rel (%p116_p9) target bundleno = 630 (0x276), region = 28 }
  0x13   : > { %v197_v0 = vld [vmem:[%s6030_s1 + $0x8] sm:$0xff]  ;;  %p137_p10 = scmp.lt.s32.totalorder %s4307_s13, 1  ;;  %v196_v1 = vld [vmem:[%s6030_s1] sm:$0xff]  ;;  %v198_v2 = vld [vmem:[%s6030_s1 + $0x10] sm:$0xff]  ;;  %vm253_vm0 = vcmask 1046528   ;;  %vm334_vm1 = vcmask 64512  }
  0x14   : > { %4166 = vmatprep.subr.mxu1 %v197_v0  ;;  %3716 = vmatprep.subr.mxu0 %v197_v0  ;;  %v4391_v21 = vld [vmem:[%s6030_s1 + $0x18] sm:$0xff]  ;;  %v4409_v28 = vld [vmem:[%s6030_s1 + $0x20] sm:$0xff]  ;;  %vm913_vm2 = vcmask 1045504   ;;  %s134_s25 = sand.u32 1, %s4260_s10   ;;  %s4270_s7 = smov [#allocation2]  }
  0x15   : > { %4167 = vmatpush3.msra.mxu1 %v197_v0  ;;  %3717 = vmatpush3.msra.mxu0 %v197_v0  ;;  %s138_s27 = scalar_select %p137_p10, %s4307_s13, 1 }
  0x16   : > { %3766 = vmatprep.subr.mxu1 %v196_v1  ;;  %3816 = vmatprep.subr.mxu0 %v198_v2  ;;  %s3125_s26 = sshll.u32 %s134_s25, 1  ;;  %s3049_s5 = scalar_lea.sflag [#allocation3], %s134_s25 }
  0x17   : > { %s4168_s28 = smul.u32 432, %s138_s27  ;;  %s5936_s27 = scalar_lea.vmem [#allocation2], %s3125_s26 }
  0x18   : > { %s3062_s29 = sshll.u32 %s5936_s27, 4  ;;  %s4212_s8 = sshll.u32 %s4270_s7, 4  ;;  %s3063_s29 = int_to_ptr.vmem [resolvable:$true] %s3062_s29  ;;  %s4213_s8 = int_to_ptr.vmem [resolvable:$false] %s4212_s8 }
  0x19   : > { %s4348_s3 = scalar_lea.vmem %s6029_s0, %s4168_s28  ;;  %s3416_s28 = sshll.u32 %s4307_s13, 5 }
  0x1a   : > { %v4351_v3 = vld [vmem:[%s4348_s3] sm:$0xff]  ;;  %v4354_v4 = vld [vmem:[%s4348_s3 + $0x8] sm:$0xff]  ;;  %v4366_v10 = vld [vmem:[%s4348_s3 + $0x10] sm:$0x3]  ;;  %s3060_s4 = scalar_lea.hbm %s6031_s2, %s3416_s28  ;;  %s4208_s6 = scalar_lea.vmem %s3063_s29, 32 }
  0x1b   : > { %v4357_v5 = vld [vmem:[%s4348_s3 + $0xc0] sm:$0xff]  ;;  %v254_v6 = vrot.slane %v4351_v3, 1  ;;  %v255_v7 = vrot.slane %v4354_v4, 1  ;;  %v4362_v8 = vld [vmem:[%s4348_s3 + $0xc8] sm:$0xff]  ;;  %v257_v12 = vrot.slane %v4366_v10, 1  ;;  %v4374_v14 = vld [vmem:[%s4348_s3 + $0x18] sm:$0xff]  ;;  %p4209_p11 = scmp.ne.s32.totalorder %s3063_s29, %s4208_s6  ;;  %p4215_p0 = scmp.lt.s32.totalorder %s3063_s29, %s4213_s8 }
  0x1c   : > { %v294_v9 = vrot.slane %v4357_v5, 1  ;;  %v295_v11 = vrot.slane %v4362_v8, 1  ;;  %v4371_v13 = vld [vmem:[%s4348_s3 + $0xd0] sm:$0x3]  ;;  %v4379_v17 = vld [vmem:[%s4348_s3 + $0x20] sm:$0xff]  ;;  %v259_v18 = vrot.slane %v4374_v14, 1 }
  0x1d   : > { %v256_v15 = vsel %vm253_vm0, %v254_v6, %v255_v7  ;;  %v297_v16 = vrot.slane %v4371_v13, 1  ;;  %v4383_v19 = vld [vmem:[%s4348_s3 + $0xd8] sm:$0xff]  ;;  %v4386_v20 = vld [vmem:[%s4348_s3 + $0xe0] sm:$0xff]  ;;  %v258_v23 = vsel %vm253_vm0, %v255_v7, %v257_v12  ;;  %v260_v24 = vrot.slane %v4379_v17, 1  ;;  %v4401_v26 = vld [vmem:[%s4348_s3 + $0x28] sm:$0x3]  ;;  %p4210_p12 = pnand %p4209_p11, %p4324_p5 }
  0x1e   : > { %3718 = vmatprep.mubr.msk.f32.mxu0 %vm334_vm1, %v256_v15  ;;  %v4395_v22 = vsel %vm253_vm0, %v294_v9, %v295_v11  ;;  %v299_v25 = vrot.slane %v4383_v19, 1  ;;  %v4404_v27 = vld [vmem:[%s4348_s3 + $0xe8] sm:$0x3]  ;;  %v300_v30 = vrot.slane %v4386_v20, 1  ;;  %v262_v31 = vrot.slane %v4401_v26, 1  ;;  %v4421_v33 = vld [vmem:[%s4348_s3 + $0x30] sm:$0xff] }
  0x1f   : > { %6116 = vst [vmem:[#allocation5_spill] sm:$0xff] %v4395_v22  ;;  %3742 = vmatprep.mubr.msk.f32.mxu1 %vm334_vm1, %v4395_v22  ;;  %3719 = vmatmul.mubr.msk.f32.vlgmr.msra.gmra.mxu0 %vm334_vm1, %v258_v23  ;;  %v4415_v29 = vsel %vm253_vm0, %v295_v11, %v297_v16  ;;  %v302_v32 = vrot.slane %v4404_v27, 1  ;;  %v4424_v34 = vld [vmem:[%s4348_s3 + $0x38] sm:$0xff]  ;;  %v4427_v35 = vld [vmem:[%s4348_s3 + $0xf0] sm:$0xff]  ;;  %v4432_v36 = vsel %vm253_vm0, %v259_v18, %v260_v24  ;;  %v264_v37 = vrot.slane %v4421_v33, 1  ;;  %v4459_v47 = vld [vmem:[%s4348_s3 + $0x48] sm:$0xff]  ;;  %p4211_p13 = pneg %p4210_p12 }
  0x20   : > { %6117 = vst [vmem:[#allocation6_spill] sm:$0xff] %v4415_v29  ;;  %3743 = vmatmul.mubr.msk.f32.vlgmr.msra.gmra.mxu1 %vm334_vm1, %v4415_v29  ;;  %3817 = vmatpush3.msra.mxu0 %v198_v2  ;;  %6118 = vst [vmem:[#allocation7_spill] sm:$0xff] %v4432_v36  ;;  %v265_v38 = vrot.slane %v4424_v34, 1  ;;  %v4437_v39 = vld [vmem:[%s4348_s3 + $0xf8] sm:$0xff]  ;;  %v304_v40 = vrot.slane %v4427_v35, 1  ;;  %v4446_v42 = vsel %vm253_vm0, %v299_v25, %v300_v30  ;;  %v4462_v48 = vld [vmem:[%s4348_s3 + $0x50] sm:$0xff] }
  0x21   : > { %v4441_v41 = vld [vmem:[%s4348_s3 + $0x40] sm:$0x3]  ;;  %3767 = vmatpush3.msra.mxu1 %v196_v1  ;;  %3721 = vmatprep.mubr.msk.f32.mxu0 %vm334_vm1, %v4432_v36  ;;  %6119 = vst [vmem:[#allocation8_spill] sm:$0xff] %v4446_v42  ;;  %v4449_v43 = vsel %vm253_vm0, %v260_v24, %v262_v31  ;;  %v4452_v44 = vsel %vm253_vm0, %v300_v30, %v302_v32  ;;  %v305_v45 = vrot.slane %v4437_v39, 1  ;;  %v269_v52 = vrot.slane %v4459_v47, 1  ;;  %v4473_v53 = vld [vmem:[%s4348_s3 + $0x108] sm:$0xff] }
  0x22   : > { %6120 = vst [vmem:[#allocation9_spill] sm:$0xff] %v4449_v43  ;;  %6121 = vst [vmem:[#allocation10_spill] sm:$0xff] %v4452_v44  ;;  %v4456_v46 = vld [vmem:[%s4348_s3 + $0x100] sm:$0x3]  ;;  %3745 = vmatprep.mubr.msk.f32.mxu1 %vm334_vm1, %v4446_v42  ;;  %v4467_v49 = vsel %vm253_vm0, %v264_v37, %v265_v38  ;;  %v267_v50 = vrot.slane %v4441_v41, 1  ;;  %v4476_v54 = vld [vmem:[%s4348_s3 + $0x110] sm:$0xff]  ;;  %3866 = vmatprep.subr.mxu1 %v4391_v21 }
  0x23   : > { %6122 = vst [vmem:[#allocation11_spill] sm:$0xff] %v4467_v49  ;;  %v307_v51 = vrot.slane %v4456_v46, 1  ;;  %v4479_v55 = vld [vmem:[%s4348_s3 + $0x60] sm:$0xff]  ;;  %3722 = vmatmul.mubr.msk.f32.gmra.mxu0 %vm334_vm1, %v4449_v43  ;;  %v4485_v56 = vsel %vm253_vm0, %v304_v40, %v305_v45  ;;  %v270_v57 = vrot.slane %v4462_v48, 1  ;;  %v309_v58 = vrot.slane %v4473_v53, 1  ;;  %v4494_v61 = vld [vmem:[%s4348_s3 + $0x68] sm:$0xff]  ;;  %3916 = vmatprep.subr.mxu0 %v4409_v28 }
  0x24   : > { %6123 = vst [vmem:[#allocation12_spill] sm:$0xff] %v4485_v56  ;;  %v310_v59 = vrot.slane %v4476_v54, 1  ;;  %v4491_v60 = vld [vmem:[%s4348_s3 + $0x58] sm:$0x3]  ;;  %3746 = vmatmul.mubr.msk.f32.gmra.mxu1 %vm334_vm1, %v4452_v44  ;;  %3724 = vmatprep.mubr.msk.f32.mxu0 %vm334_vm1, %v4467_v49  ;;  %v4502_v62 = vsel %vm253_vm0, %v265_v38, %v267_v50  ;;  %v274_v1 = vrot.slane %v4479_v55, 1  ;;  %v4510_v2 = vld [vmem:[%s4348_s3 + $0x120] sm:$0xff] }
  0x25   : > { %6124 = vst [vmem:[#allocation13_spill] sm:$0xff] %v4502_v62  ;;  %v272_v63 = vrot.slane %v4491_v60, 1  ;;  %v4506_v0 = vld [vmem:[%s4348_s3 + $0x118] sm:$0x3]  ;;  %v4513_v6 = vld [vmem:[%s4348_s3 + $0x128] sm:$0xff]  ;;  %3748 = vmatprep.mubr.msk.f32.mxu1 %vm334_vm1, %v4485_v56  ;;  %v4518_v7 = vsel %vm253_vm0, %v305_v45, %v307_v51  ;;  %v4521_v9 = vsel %vm253_vm0, %v269_v52, %v270_v57  ;;  %v275_v12 = vrot.slane %v4494_v61, 1 }
  0x26   : > { %6125 = vst [vmem:[#allocation14_spill] sm:$0xff] %v4518_v7  ;;  %6126 = vst [vmem:[#allocation15_spill] sm:$0xff] %v4521_v9  ;;  %v312_v11 = vrot.slane %v4506_v0, 1  ;;  %v4526_v15 = vld [vmem:[%s4348_s3 + $0x70] sm:$0x3]  ;;  %v4532_v18 = vsel %vm253_vm0, %v309_v58, %v310_v59  ;;  %v314_v23 = vrot.slane %v4510_v2, 1 }
  0x27   : > { %v4529_v16 = vld [vmem:[%s4348_s3 + $0x130] sm:$0x3]  ;;  %6127 = vst [vmem:[#allocation16_spill] sm:$0xff] %v4532_v18  ;;  %v315_v24 = vrot.slane %v4513_v6, 1  ;;  %v4537_v25 = vld [vmem:[%s4348_s3 + $0x78] sm:$0xff]  ;;  %v4540_v30 = vld [vmem:[%s4348_s3 + $0x80] sm:$0xff]  ;;  %3725 = vmatmul.mubr.msk.f32.gmra.mxu0 %vm334_vm1, %v4502_v62  ;;  %v4555_v37 = vsel %vm253_vm0, %v270_v57, %v272_v63  ;;  %v4565_v50 = vsel %vm253_vm0, %v274_v1, %v275_v12 }
  0x28   : > { %v4545_v31 = vld [vmem:[%s4348_s3 + $0x138] sm:$0xff]  ;;  %v4548_v32 = vld [vmem:[%s4348_s3 + $0x140] sm:$0xff]  ;;  %3749 = vmatmul.mubr.msk.f32.gmra.mxu1 %vm334_vm1, %v4518_v7  ;;  %3727 = vmatprep.mubr.msk.f32.mxu0 %vm334_vm1, %v4521_v9  ;;  %6128 = vst [vmem:[#allocation17_spill] sm:$0xff] %v4555_v37  ;;  %v277_v38 = vrot.slane %v4526_v15, 1  ;;  %v317_v40 = vrot.slane %v4529_v16, 1  ;;  %v4562_v45 = vsel %vm253_vm0, %v310_v59, %v312_v11  ;;  %6130 = vst [vmem:[#allocation19_spill] sm:$0xff] %v4565_v50 }
  0x29   : > { %3751 = vmatprep.mubr.msk.f32.mxu1 %vm334_vm1, %v4532_v18  ;;  %6129 = vst [vmem:[#allocation18_spill] sm:$0xff] %v4562_v45  ;;  %v279_v51 = vrot.slane %v4537_v25, 1  ;;  %v280_v52 = vrot.slane %v4540_v30, 1  ;;  %v4570_v57 = vld [vmem:[%s4348_s3 + $0x88] sm:$0x3]  ;;  %v4576_v63 = vsel %vm253_vm0, %v314_v23, %v315_v24  ;;  %v319_v7 = vrot.slane %v4545_v31, 1 }
  0x2a   : > { %v4573_v58 = vld [vmem:[%s4348_s3 + $0x148] sm:$0x3]  ;;  %6131 = vst [vmem:[#allocation20_spill] sm:$0xff] %v4576_v63  ;;  %v320_v18 = vrot.slane %v4548_v32, 1  ;;  %v4581_v59 = vld [vmem:[%s4348_s3 + $0x90] sm:$0xff]  ;;  %v4584_v1 = vld [vmem:[%s4348_s3 + $0x98] sm:$0xff]  ;;  %v4599_v23 = vsel %vm253_vm0, %v275_v12, %v277_v38  ;;  %v4606_v29 = vsel %vm253_vm0, %v315_v24, %v317_v40 }
  0x2b   : > { %3728 = vmatmul.mubr.msk.f32.gmra.mxu0 %vm334_vm1, %v4555_v37  ;;  %v4589_v11 = vld [vmem:[%s4348_s3 + $0x150] sm:$0xff]  ;;  %v4592_v56 = vld [vmem:[%s4348_s3 + $0x158] sm:$0xff]  ;;  %6133 = vst [vmem:[#allocation22_spill] sm:$0xff] %v4599_v23  ;;  %v282_v44 = vrot.slane %v4570_v57, 1  ;;  %v322_v42 = vrot.slane %v4573_v58, 1  ;;  %6134 = vst [vmem:[#allocation23_spill] sm:$0xff] %v4606_v29 }
  0x2c   : > { %6132 = vst [vmem:[#allocation21_spill] sm:$0xff] %v4592_v56  ;;  %3752 = vmatmul.mubr.msk.f32.gmra.mxu1 %vm334_vm1, %v4562_v45  ;;  %3730 = vmatprep.mubr.msk.f32.mxu0 %vm334_vm1, %v4565_v50  ;;  %v4609_v45 = vsel %vm253_vm0, %v279_v51, %v280_v52  ;;  %v284_v22 = vrot.slane %v4581_v59, 1  ;;  %v285_v12 = vrot.slane %v4584_v1, 1  ;;  %v4614_v38 = vld [vmem:[%s4348_s3 + $0xa0] sm:$0x3]  ;;  %v4617_v50 = vsel %vm253_vm0, %v319_v7, %v320_v18  ;;  %v4625_v24 = vld [vmem:[%s4348_s3 + $0xa8] sm:$0xff] }
  0x2d   : > { %3754 = vmatprep.mubr.msk.f32.mxu1 %vm334_vm1, %v4576_v63  ;;  %6135 = vst [vmem:[#allocation24_spill] sm:$0xff] %v4609_v45  ;;  %6136 = vst [vmem:[#allocation25_spill] sm:$0xff] %v4617_v50  ;;  %v324_v37 = vrot.slane %v4589_v11, 1  ;;  %v325_v9 = vrot.slane %v4592_v56, 1  ;;  %v4622_v63 = vld [vmem:[%s4348_s3 + $0x160] sm:$0x3]  ;;  %v4643_v7 = vsel %vm253_vm0, %v280_v52, %v282_v44  ;;  %v4646_v49 = vsel %vm253_vm0, %v320_v18, %v322_v42 }
  0x2e   : > { %v4628_v40 = vld [vmem:[%s4348_s3 + $0xb0] sm:$0xff]  ;;  %v4633_v51 = vld [vmem:[%s4348_s3 + $0x168] sm:$0xff]  ;;  %6138 = vst [vmem:[#allocation27_spill] sm:$0xff] %v4643_v7  ;;  %6139 = vst [vmem:[#allocation28_spill] sm:$0xff] %v4646_v49  ;;  %v287_v43 = vrot.slane %v4614_v38, 1  ;;  %v327_v36 = vrot.slane %v4622_v63, 1 }
  0x2f   : > { %3731 = vmatmul.mubr.msk.f32.gmra.mxu0 %vm334_vm1, %v4599_v23  ;;  %v4636_v62 = vld [vmem:[%s4348_s3 + $0x170] sm:$0xff]  ;;  %v4652_v23 = vsel %vm253_vm0, %v284_v22, %v285_v12  ;;  %v4658_v56 = vld [vmem:[%s4348_s3 + $0xb8] sm:$0x3]  ;;  %v4661_v44 = vsel %vm253_vm0, %v324_v37, %v325_v9  ;;  %v329_v42 = vrot.slane %v4633_v51, 1  ;;  %s4214_s13 = scalar_lea.vmem %s4213_s8, 64 }
  0x30   : > { %6137 = vst [vmem:[#allocation26_spill] sm:$0xff] %v4636_v62  ;;  %3755 = vmatmul.mubr.msk.f32.gmra.mxu1 %vm334_vm1, %v4606_v29  ;;  %3733 = vmatprep.mubr.msk.f32.mxu0 %vm334_vm1, %v4609_v45  ;;  %6140 = vst [vmem:[#allocation29_spill] sm:$0xff] %v4652_v23  ;;  %v289_v29 = vrot.slane %v4625_v24, 1  ;;  %v290_v45 = vrot.slane %v4628_v40, 1  ;;  %v330_v18 = vrot.slane %v4636_v62, 1  ;;  %v4675_v22 = vsel %vm253_vm0, %v285_v12, %v287_v43  ;;  %p4216_p1 = scmp.lt.s32.totalorder %s4214_s13, %s4208_s6 }
  0x31   : > { %3757 = vmatprep.mubr.msk.f32.mxu1 %vm334_vm1, %v4617_v50  ;;  %6141 = vst [vmem:[#allocation30_spill] sm:$0xff] %v4661_v44  ;;  %v4666_v52 = vld [vmem:[%s4348_s3 + $0x178] sm:$0x3]  ;;  %6142 = vst [vmem:[#allocation31_spill] sm:$0xff] %v4675_v22  ;;  %v292_v37 = vrot.slane %v4658_v56, 1  ;;  %v914_v50 = vrot.slane %v4351_v3, 2  ;;  %v4682_v62 = vsel %vm253_vm0, %v325_v9, %v327_v36 }
  0x32   : > { %6143 = vst [vmem:[#allocation32_spill] sm:$0xff] %v4682_v62  ;;  %v4690_v43 = vsel %vm253_vm0, %v329_v42, %v330_v18  ;;  %v917_v12 = vrot.slane %v4366_v10, 2  ;;  %v919_v10 = vrot.slane %v4374_v14, 2  ;;  %v920_v42 = vrot.slane %v4379_v17, 2  ;;  %p4217_p2 = por %p4216_p1, %p4215_p0 }
  0x33   : > { %3734 = vmatmul.mubr.msk.f32.gmra.mxu0 %vm334_vm1, %v4643_v7  ;;  %v4685_v7 = vsel %vm253_vm0, %v289_v29, %v290_v45  ;;  %6145 = vst [vmem:[#allocation34_spill] sm:$0xff] %v4690_v43  ;;  %v4700_v29 = vsel %vm253_vm0, %v290_v45, %v292_v37  ;;  %v922_v37 = vrot.slane %v4401_v26, 2  ;;  %v927_v26 = vrot.slane %v4441_v41, 2 }
  0x34   : > { %3758 = vmatmul.mubr.msk.f32.gmra.mxu1 %vm334_vm1, %v4646_v49  ;;  %3736 = vmatprep.mubr.msk.f32.mxu0 %vm334_vm1, %v4652_v23  ;;  %6144 = vst [vmem:[#allocation33_spill] sm:$0xff] %v4685_v7  ;;  %v332_v49 = vrot.slane %v4666_v52, 1  ;;  %v915_v23 = vrot.slane %v4354_v4, 2  ;;  %6146 = vst [vmem:[#allocation35_spill] sm:$0xff] %v4700_v29  ;;  %v932_v41 = vrot.slane %v4491_v60, 2  ;;  %p4218_p3 = pnand %p4217_p2, %p4211_p13 }
  0x35   : > { %3760 = vmatprep.mubr.msk.f32.mxu1 %vm334_vm1, %v4661_v44 }
  0x36   : > { %v4705_v36 = vsel %vm253_vm0, %v330_v18, %v332_v49  ;;  %v916_v9 = vsel %vm913_vm2, %v914_v50, %v915_v23  ;;  %v918_v45 = vsel %vm913_vm2, %v915_v23, %v917_v12  ;;  %v924_v49 = vrot.slane %v4421_v33, 2  ;;  %v4740_v23 = vld [vmem:[%s6030_s1 + $0x30] sm:$0xff] }
  0x37   : > { %3737 = vmatmul.mubr.msk.f32.gmra.mxu0 %vm334_vm1, %v4675_v22  ;;  %6147 = vst [vmem:[#allocation36_spill] sm:$0xff] %v4705_v36  ;;  %v925_v50 = vrot.slane %v4424_v34, 2  ;;  %v4723_v18 = vsel %vm913_vm2, %v919_v10, %v920_v42 }
  0x38   : > { %3761 = vmatmul.mubr.msk.f32.gmra.mxu1 %vm334_vm1, %v4682_v62  ;;  %3739 = vmatprep.mubr.msk.f32.mxu0 %vm334_vm1, %v4685_v7 }
  0x39   : > { %3763 = vmatprep.mubr.msk.f32.mxu1 %vm334_vm1, %v4690_v43  ;;  %v4746_v12 = vsel %vm913_vm2, %v924_v49, %v925_v50 }
  0x3b   : > { %3740 = vmatmul.mubr.msk.f32.gmra.mxu0 %vm334_vm1, %v4700_v29 }
  0x3c   : > { %3764 = vmatmul.mubr.msk.f32.gmra.mxu1 %vm334_vm1, %v4705_v36  ;;  %3818 = vmatprep.mubr.msk.f32.mxu0 %vm334_vm1, %v916_v9  ;;  %v4728_v9 = vld [vmem:[%s6030_s1 + $0x28] sm:$0xff] }
  0x3d   : > { %3768 = vmatprep.mubr.msk.f32.mxu1 %vm334_vm1, %v4351_v3  ;;  %v4734_v3 = vsel %vm913_vm2, %v920_v42, %v922_v37  ;;  %v934_v42 = vrot.slane %v4479_v55, 2  ;;  %v937_v37 = vrot.slane %v4526_v15, 2 }
  0x3f   : > { %3819 = vmatmul.mubr.msk.f32.vlgmr.msra.gmra.mxu0 %vm334_vm1, %v918_v45  ;;  %v935_v45 = vrot.slane %v4494_v61, 2 }
  0x40   : > { %3769 = vmatmul.mubr.msk.f32.vlgmr.msra.gmra.mxu1 %vm334_vm1, %v4354_v4  ;;  %3917 = vmatpush3.msra.mxu0 %v4409_v28  ;;  %v929_v4 = vrot.slane %v4459_v47, 2  ;;  %v930_v28 = vrot.slane %v4462_v48, 2 }
  0x41   : > { %3867 = vmatpush3.msra.mxu1 %v4391_v21  ;;  %3771 = vmatprep.mubr.msk.f32.mxu1 %vm334_vm1, %v4374_v14  ;;  %v4761_v21 = vsel %vm913_vm2, %v925_v50, %v927_v26  ;;  %v4784_v49 = vsel %vm913_vm2, %v934_v42, %v935_v45  ;;  %v939_v50 = vrot.slane %v4537_v25, 2  ;;  %v940_v26 = vrot.slane %v4540_v30, 2 }
  0x42   : > { %3821 = vmatprep.mubr.msk.f32.mxu0 %vm334_vm1, %v4723_v18  ;;  %3966 = vmatprep.subr.mxu1 %v4728_v9  ;;  %v4767_v10 = vsel %vm913_vm2, %v929_v4, %v930_v28  ;;  %v4778_v60 = vsel %vm913_vm2, %v930_v28, %v932_v41  ;;  %v4795_v15 = vsel %vm913_vm2, %v935_v45, %v937_v37  ;;  %v942_v4 = vrot.slane %v4570_v57, 2 }
  0x43   : > { %3822 = vmatmul.mubr.msk.f32.gmra.mxu0 %vm334_vm1, %v4734_v3  ;;  %4016 = vmatprep.subr.mxu0 %v4740_v23  ;;  %6148 = vst [vmem:[#allocation37_spill] sm:$0xff] %v4795_v15  ;;  %v4801_v28 = vsel %vm913_vm2, %v939_v50, %v940_v26  ;;  %v944_v41 = vrot.slane %v4581_v59, 2  ;;  %v945_v42 = vrot.slane %v4584_v1, 2  ;;  %v947_v45 = vrot.slane %v4614_v38, 2 }
  0x44   : > { %3772 = vmatmul.mubr.msk.f32.gmra.mxu1 %vm334_vm1, %v4379_v17  ;;  %3824 = vmatprep.mubr.msk.f32.mxu0 %vm334_vm1, %v4746_v12  ;;  %v4812_v57 = vsel %vm913_vm2, %v940_v26, %v942_v4  ;;  %v949_v50 = vrot.slane %v4625_v24, 2  ;;  %v952_v26 = vrot.slane %v4658_v56, 2 }
  0x45   : > { %3774 = vmatprep.mubr.msk.f32.mxu1 %vm334_vm1, %v4421_v33  ;;  %6149 = vst [vmem:[#allocation38_spill] sm:$0xff] %v4812_v57  ;;  %v4818_v37 = vsel %vm913_vm2, %v944_v41, %v945_v42  ;;  %v4829_v38 = vsel %vm913_vm2, %v945_v42, %v947_v45  ;;  %v954_v41 = vrot.slane %v4357_v5, 2  ;;  %v957_v42 = vrot.slane %v4371_v13, 2 }
  0x46   : > { %6150 = vst [vmem:[#allocation39_spill] sm:$0xff] %v4829_v38 }
  0x47   : > { %3825 = vmatmul.mubr.msk.f32.gmra.mxu0 %vm334_vm1, %v4761_v21 }
  0x48   : > { %3775 = vmatmul.mubr.msk.f32.gmra.mxu1 %vm334_vm1, %v4424_v34  ;;  %3827 = vmatprep.mubr.msk.f32.mxu0 %vm334_vm1, %v4767_v10 }
  0x49   : > { %3777 = vmatprep.mubr.msk.f32.mxu1 %vm334_vm1, %v4459_v47 }
  0x4b   : > { %3828 = vmatmul.mubr.msk.f32.gmra.mxu0 %vm334_vm1, %v4778_v60 }
  0x4c   : > { %3778 = vmatmul.mubr.msk.f32.gmra.mxu1 %vm334_vm1, %v4462_v48  ;;  %3830 = vmatprep.mubr.msk.f32.mxu0 %vm334_vm1, %v4784_v49 }
  0x4d   : > { %3780 = vmatprep.mubr.msk.f32.mxu1 %vm334_vm1, %v4479_v55 }
  0x4f   : > { %3831 = vmatmul.mubr.msk.f32.gmra.mxu0 %vm334_vm1, %v4795_v15  ;;  %v950_v15 = vrot.slane %v4628_v40, 2 }
  0x50   : > { %3781 = vmatmul.mubr.msk.f32.gmra.mxu1 %vm334_vm1, %v4494_v61  ;;  %3833 = vmatprep.mubr.msk.f32.mxu0 %vm334_vm1, %v4801_v28 }
  0x51   : > { %3783 = vmatprep.mubr.msk.f32.mxu1 %vm334_vm1, %v4537_v25  ;;  %v4835_v4 = vsel %vm913_vm2, %v949_v50, %v950_v15  ;;  %v4846_v56 = vsel %vm913_vm2, %v950_v15, %v952_v26  ;;  %v959_v50 = vrot.slane %v4383_v19, 2  ;;  %v962_v15 = vrot.slane %v4404_v27, 2 }
  0x52   : > { %6151 = vst [vmem:[#allocation40_spill] sm:$0xff] %v4846_v56 }
  0x53   : > { %3834 = vmatmul.mubr.msk.f32.gmra.mxu0 %vm334_vm1, %v4812_v57  ;;  %v955_v57 = vrot.slane %v4362_v8, 2 }
  0x54   : > { %3784 = vmatmul.mubr.msk.f32.gmra.mxu1 %vm334_vm1, %v4540_v30  ;;  %3836 = vmatprep.mubr.msk.f32.mxu0 %vm334_vm1, %v4818_v37 }
  0x55   : > { %3786 = vmatprep.mubr.msk.f32.mxu1 %vm334_vm1, %v4581_v59  ;;  %v4852_v45 = vsel %vm913_vm2, %v954_v41, %v955_v57  ;;  %v4863_v13 = vsel %vm913_vm2, %v955_v57, %v957_v42  ;;  %v964_v41 = vrot.slane %v4427_v35, 2  ;;  %v967_v57 = vrot.slane %v4456_v46, 2 }
  0x56   : > { %6152 = vst [vmem:[#allocation41_spill] sm:$0xff] %v4863_v13 }
  0x57   : > { %3837 = vmatmul.mubr.msk.f32.gmra.mxu0 %vm334_vm1, %v4829_v38  ;;  %v960_v38 = vrot.slane %v4386_v20, 2 }
  0x58   : > { %3787 = vmatmul.mubr.msk.f32.gmra.mxu1 %vm334_vm1, %v4584_v1  ;;  %3839 = vmatprep.mubr.msk.f32.mxu0 %vm334_vm1, %v4835_v4 }
  0x59   : > { %3789 = vmatprep.mubr.msk.f32.mxu1 %vm334_vm1, %v4625_v24  ;;  %v4869_v26 = vsel %vm913_vm2, %v959_v50, %v960_v38  ;;  %v4880_v27 = vsel %vm913_vm2, %v960_v38, %v962_v15  ;;  %v969_v50 = vrot.slane %v4473_v53, 2  ;;  %v972_v38 = vrot.slane %v4506_v0, 2 }
  0x5a   : > { %6153 = vst [vmem:[#allocation42_spill] sm:$0xff] %v4880_v27 }
  0x5b   : > { %3840 = vmatmul.mubr.msk.f32.gmra.mxu0 %vm334_vm1, %v4846_v56  ;;  %v965_v56 = vrot.slane %v4437_v39, 2 }
  0x5c   : > { %3790 = vmatmul.mubr.msk.f32.gmra.mxu1 %vm334_vm1, %v4628_v40  ;;  %3842 = vmatprep.mubr.msk.f32.mxu0 %vm334_vm1, %v4852_v45 }
  0x5d   : > { %3792 = vmatprep.mubr.msk.f32.mxu1 %vm334_vm1, %v4357_v5  ;;  %v4886_v42 = vsel %vm913_vm2, %v964_v41, %v965_v56  ;;  %v4897_v46 = vsel %vm913_vm2, %v965_v56, %v967_v57  ;;  %v974_v41 = vrot.slane %v4510_v2, 2  ;;  %v977_v56 = vrot.slane %v4529_v16, 2 }
  0x5e   : > { %6154 = vst [vmem:[#allocation43_spill] sm:$0xff] %v4897_v46 }
  0x5f   : > { %3843 = vmatmul.mubr.msk.f32.gmra.mxu0 %vm334_vm1, %v4863_v13  ;;  %v970_v13 = vrot.slane %v4476_v54, 2 }
  0x60   : > { %3793 = vmatmul.mubr.msk.f32.gmra.mxu1 %vm334_vm1, %v4362_v8  ;;  %3845 = vmatprep.mubr.msk.f32.mxu0 %vm334_vm1, %v4869_v26 }
  0x61   : > { %3795 = vmatprep.mubr.msk.f32.mxu1 %vm334_vm1, %v4383_v19  ;;  %v4903_v15 = vsel %vm913_vm2, %v969_v50, %v970_v13  ;;  %v4914_v0 = vsel %vm913_vm2, %v970_v13, %v972_v38  ;;  %v979_v50 = vrot.slane %v4545_v31, 2  ;;  %v982_v13 = vrot.slane %v4573_v58, 2 }
  0x62   : > { %6155 = vst [vmem:[#allocation44_spill] sm:$0xff] %v4903_v15  ;;  %6156 = vst [vmem:[#allocation45_spill] sm:$0xff] %v4914_v0 }
  0x63   : > { %3846 = vmatmul.mubr.msk.f32.gmra.mxu0 %vm334_vm1, %v4880_v27  ;;  %v975_v27 = vrot.slane %v4513_v6, 2 }
  0x64   : > { %3796 = vmatmul.mubr.msk.f32.gmra.mxu1 %vm334_vm1, %v4386_v20  ;;  %3848 = vmatprep.mubr.msk.f32.mxu0 %vm334_vm1, %v4886_v42 }
  0x65   : > { %3798 = vmatprep.mubr.msk.f32.mxu1 %vm334_vm1, %v4427_v35  ;;  %v4920_v57 = vsel %vm913_vm2, %v974_v41, %v975_v27  ;;  %v4931_v16 = vsel %vm913_vm2, %v975_v27, %v977_v56  ;;  %v984_v41 = vrot.slane %v4589_v11, 2  ;;  %v987_v27 = vrot.slane %v4622_v63, 2 }
  0x66   : > { %6157 = vst [vmem:[#allocation46_spill] sm:$0xff] %v4920_v57  ;;  %6158 = vst [vmem:[#allocation47_spill] sm:$0xff] %v4931_v16 }
  0x67   : > { %3849 = vmatmul.mubr.msk.f32.gmra.mxu0 %vm334_vm1, %v4897_v46  ;;  %v980_v46 = vrot.slane %v4548_v32, 2 }
  0x68   : > { %3799 = vmatmul.mubr.msk.f32.gmra.mxu1 %vm334_vm1, %v4437_v39  ;;  %3851 = vmatprep.mubr.msk.f32.mxu0 %vm334_vm1, %v4903_v15 }
  0x69   : > { %3801 = vmatprep.mubr.msk.f32.mxu1 %vm334_vm1, %v4473_v53  ;;  %v4937_v38 = vsel %vm913_vm2, %v979_v50, %v980_v46  ;;  %v4948_v58 = vsel %vm913_vm2, %v980_v46, %v982_v13  ;;  %v989_v50 = vrot.slane %v4633_v51, 2  ;;  %v992_v46 = vrot.slane %v4666_v52, 2  ;;  %v6162_v52 = vld [vmem:[#allocation7_spill] sm:$0xff] }
  0x6b   : > { %3852 = vmatmul.mubr.msk.f32.gmra.mxu0 %vm334_vm1, %v4914_v0  ;;  %v6159_v0 = vld [vmem:[#allocation21_spill] sm:$0xff] }
  0x6c   : > { %3802 = vmatmul.mubr.msk.f32.gmra.mxu1 %vm334_vm1, %v4476_v54  ;;  %3854 = vmatprep.mubr.msk.f32.mxu0 %vm334_vm1, %v4920_v57  ;;  %v985_v15 = vrot.slane %v6159_v0, 2 }
  0x6d   : > { %3804 = vmatprep.mubr.msk.f32.mxu1 %vm334_vm1, %v4510_v2 }
  0x6e   : > { %v4954_v56 = vsel %vm913_vm2, %v984_v41, %v985_v15  ;;  %v4965_v63 = vsel %vm913_vm2, %v985_v15, %v987_v27  ;;  %v6163_v41 = vld [vmem:[#allocation9_spill] sm:$0xff] }
  0x6f   : > { %3855 = vmatmul.mubr.msk.f32.gmra.mxu0 %vm334_vm1, %v4931_v16  ;;  %v6160_v16 = vld [vmem:[#allocation26_spill] sm:$0xff]  ;;  %v5005_v27 = vld [vmem:[%s6030_s1 + $0x40] sm:$0xff] }
  0x70   : > { %3805 = vmatmul.mubr.msk.f32.gmra.mxu1 %vm334_vm1, %v4513_v6  ;;  %3857 = vmatprep.mubr.msk.f32.mxu0 %vm334_vm1, %v4937_v38  ;;  %v990_v57 = vrot.slane %v6160_v16, 2 }
  0x71   : > { %3807 = vmatprep.mubr.msk.f32.mxu1 %vm334_vm1, %v4545_v31 }
  0x72   : > { %v4971_v13 = vsel %vm913_vm2, %v989_v50, %v990_v57  ;;  %v4980_v15 = vsel %vm913_vm2, %v990_v57, %v992_v46  ;;  %v4997_v57 = vld [vmem:[%s6030_s1 + $0x38] sm:$0xff]  ;;  %v6165_v50 = vld [vmem:[#allocation13_spill] sm:$0xff]  ;;  %v6169_v46 = vld [vmem:[#allocation22_spill] sm:$0xff] }
  0x73   : > { %3858 = vmatmul.mubr.msk.f32.gmra.mxu0 %vm334_vm1, %v4948_v58  ;;  %6161 = vst [vmem:[#allocation21_spill] sm:$0xff] %v4980_v15 }
  0x74   : > { %3808 = vmatmul.mubr.msk.f32.gmra.mxu1 %vm334_vm1, %v4548_v32  ;;  %3860 = vmatprep.mubr.msk.f32.mxu0 %vm334_vm1, %v4954_v56 }
  0x75   : > { %3810 = vmatprep.mubr.msk.f32.mxu1 %vm334_vm1, %v4589_v11 }
  0x77   : > { %3861 = vmatmul.mubr.msk.f32.gmra.mxu0 %vm334_vm1, %v4965_v63 }
  0x78   : > { %3811 = vmatmul.mubr.msk.f32.gmra.mxu1 %vm334_vm1, %v6159_v0  ;;  %3863 = vmatprep.mubr.msk.f32.mxu0 %vm334_vm1, %v4971_v13 }
  0x79   : > { %3813 = vmatprep.mubr.msk.f32.mxu1 %vm334_vm1, %v4633_v51 }
  0x7b   : > { %3864 = vmatmul.mubr.msk.f32.gmra.mxu0 %vm334_vm1, %v4980_v15 }
  0x7c   : > { %3814 = vmatmul.mubr.msk.f32.gmra.mxu1 %vm334_vm1, %v6160_v16  ;;  %3918 = vmatprep.mubr.msk.f32.mxu0 %vm334_vm1, %v6162_v52  ;;  %v6170_v52 = vld [vmem:[#allocation24_spill] sm:$0xff] }
  0x7d   : > { %3868 = vmatprep.mubr.msk.f32.mxu1 %vm334_vm1, %v4374_v14  ;;  %v6164_v14 = vld [vmem:[#allocation11_spill] sm:$0xff] }
  0x7f   : > { %3919 = vmatmul.mubr.msk.f32.vlgmr.msra.gmra.mxu0 %vm334_vm1, %v6163_v41  ;;  %v6171_v41 = vld [vmem:[#allocation27_spill] sm:$0xff] }
  0x80   : > { %3869 = vmatmul.mubr.msk.f32.vlgmr.msra.gmra.mxu1 %vm334_vm1, %v4379_v17  ;;  %4017 = vmatpush3.msra.mxu0 %v4740_v23  ;;  %v6166_v17 = vld [vmem:[#allocation15_spill] sm:$0xff] }
  0x81   : > { %3967 = vmatpush3.msra.mxu1 %v4728_v9  ;;  %3871 = vmatprep.mubr.msk.f32.mxu1 %vm334_vm1, %v4421_v33  ;;  %v6167_v9 = vld [vmem:[#allocation17_spill] sm:$0xff]  ;;  %v6168_v23 = vld [vmem:[#allocation19_spill] sm:$0xff] }
  0x82   : > { %3921 = vmatprep.mubr.msk.f32.mxu0 %vm334_vm1, %v6164_v14  ;;  %4066 = vmatprep.subr.mxu1 %v4997_v57 }
  0x83   : > { %3922 = vmatmul.mubr.msk.f32.gmra.mxu0 %vm334_vm1, %v6165_v50  ;;  %4116 = vmatprep.subr.mxu0 %v5005_v27 }
  0x84   : > { %3872 = vmatmul.mubr.msk.f32.gmra.mxu1 %vm334_vm1, %v4424_v34  ;;  %3924 = vmatprep.mubr.msk.f32.mxu0 %vm334_vm1, %v6166_v17 }
  0x85   : > { %3874 = vmatprep.mubr.msk.f32.mxu1 %vm334_vm1, %v4459_v47 }
  0x87   : > { %3925 = vmatmul.mubr.msk.f32.gmra.mxu0 %vm334_vm1, %v6167_v9 }
  0x88   : > { %3875 = vmatmul.mubr.msk.f32.gmra.mxu1 %vm334_vm1, %v4462_v48  ;;  %3927 = vmatprep.mubr.msk.f32.mxu0 %vm334_vm1, %v6168_v23  ;;  %v6172_v23 = vld [vmem:[#allocation29_spill] sm:$0xff] }
  0x89   : > { %3877 = vmatprep.mubr.msk.f32.mxu1 %vm334_vm1, %v4479_v55 }
  0x8b   : > { %3928 = vmatmul.mubr.msk.f32.gmra.mxu0 %vm334_vm1, %v6169_v46 }
  0x8c   : > { %3878 = vmatmul.mubr.msk.f32.gmra.mxu1 %vm334_vm1, %v4494_v61  ;;  %3930 = vmatprep.mubr.msk.f32.mxu0 %vm334_vm1, %v6170_v52  ;;  %v5119_v52 = vld [vmem:[%s4348_s3 + $0x190] sm:$0x3] }
  0x8d   : > { %3880 = vmatprep.mubr.msk.f32.mxu1 %vm334_vm1, %v4537_v25 }
  0x8f   : > { %3931 = vmatmul.mubr.msk.f32.gmra.mxu0 %vm334_vm1, %v6171_v41  ;;  %v5106_v41 = vld [vmem:[%s4348_s3 + $0x188] sm:$0xff] }
  0x90   : > { %3881 = vmatmul.mubr.msk.f32.gmra.mxu1 %vm334_vm1, %v4540_v30  ;;  %3933 = vmatprep.mubr.msk.f32.mxu0 %vm334_vm1, %v6172_v23  ;;  %v6173_v23 = vld [vmem:[#allocation5_spill] sm:$0xff] }
  0x91   : > { %3883 = vmatprep.mubr.msk.f32.mxu1 %vm334_vm1, %v4581_v59 }
  0x93   : > { %3934 = vmatmul.mubr.msk.f32.gmra.mxu0 %vm334_vm1, %v4675_v22  ;;  %v6174_v22 = vld [vmem:[#allocation6_spill] sm:$0xff] }
  0x94   : > { %3884 = vmatmul.mubr.msk.f32.gmra.mxu1 %vm334_vm1, %v4584_v1  ;;  %3936 = vmatprep.mubr.msk.f32.mxu0 %vm334_vm1, %v4685_v7  ;;  %v6175_v7 = vld [vmem:[#allocation8_spill] sm:$0xff] }
  0x95   : > { %3886 = vmatprep.mubr.msk.f32.mxu1 %vm334_vm1, %v4625_v24 }
  0x97   : > { %3937 = vmatmul.mubr.msk.f32.gmra.mxu0 %vm334_vm1, %v4700_v29  ;;  %v6176_v29 = vld [vmem:[#allocation10_spill] sm:$0xff] }
  0x98   : > { %3887 = vmatmul.mubr.msk.f32.gmra.mxu1 %vm334_vm1, %v4628_v40  ;;  %3939 = vmatprep.mubr.msk.f32.mxu0 %vm334_vm1, %v6173_v23  ;;  %v6177_v23 = vld [vmem:[#allocation12_spill] sm:$0xff] }
  0x99   : > { %3889 = vmatprep.mubr.msk.f32.mxu1 %vm334_vm1, %v4357_v5 }
  0x9b   : > { %3940 = vmatmul.mubr.msk.f32.gmra.mxu0 %vm334_vm1, %v6174_v22  ;;  %v6178_v22 = vld [vmem:[#allocation14_spill] sm:$0xff] }
  0x9c   : > { %3890 = vmatmul.mubr.msk.f32.gmra.mxu1 %vm334_vm1, %v4362_v8  ;;  %3942 = vmatprep.mubr.msk.f32.mxu0 %vm334_vm1, %v6175_v7  ;;  %v6179_v7 = vld [vmem:[#allocation16_spill] sm:$0xff] }
  0x9d   : > { %3892 = vmatprep.mubr.msk.f32.mxu1 %vm334_vm1, %v4383_v19 }
  0x9f   : > { %3943 = vmatmul.mubr.msk.f32.gmra.mxu0 %vm334_vm1, %v6176_v29  ;;  %v6180_v29 = vld [vmem:[#allocation18_spill] sm:$0xff] }
  0xa0   : > { %3893 = vmatmul.mubr.msk.f32.gmra.mxu1 %vm334_vm1, %v4386_v20  ;;  %3945 = vmatprep.mubr.msk.f32.mxu0 %vm334_vm1, %v6177_v23  ;;  %v6181_v23 = vld [vmem:[#allocation20_spill] sm:$0xff] }
  0xa1   : > { %3895 = vmatprep.mubr.msk.f32.mxu1 %vm334_vm1, %v4427_v35 }
  0xa3   : > { %3946 = vmatmul.mubr.msk.f32.gmra.mxu0 %vm334_vm1, %v6178_v22  ;;  %v6182_v22 = vld [vmem:[#allocation23_spill] sm:$0xff] }
  0xa4   : > { %3896 = vmatmul.mubr.msk.f32.gmra.mxu1 %vm334_vm1, %v4437_v39  ;;  %3948 = vmatprep.mubr.msk.f32.mxu0 %vm334_vm1, %v6179_v7  ;;  %v6183_v7 = vld [vmem:[#allocation25_spill] sm:$0xff] }
  0xa5   : > { %3898 = vmatprep.mubr.msk.f32.mxu1 %vm334_vm1, %v4473_v53 }
  0xa7   : > { %3949 = vmatmul.mubr.msk.f32.gmra.mxu0 %vm334_vm1, %v6180_v29  ;;  %v5103_v29 = vld [vmem:[%s4348_s3 + $0x180] sm:$0xff] }
  0xa8   : > { %3899 = vmatmul.mubr.msk.f32.gmra.mxu1 %vm334_vm1, %v4476_v54  ;;  %3951 = vmatprep.mubr.msk.f32.mxu0 %vm334_vm1, %v6181_v23  ;;  %v6184_v23 = vld [vmem:[#allocation28_spill] sm:$0xff] }
  0xa9   : > { %3901 = vmatprep.mubr.msk.f32.mxu1 %vm334_vm1, %v4510_v2 }
  0xab   : > { %3952 = vmatmul.mubr.msk.f32.gmra.mxu0 %vm334_vm1, %v6182_v22  ;;  %v1580_v22 = vrot.slane %v5106_v41, 1 }
  0xac   : > { %3902 = vmatmul.mubr.msk.f32.gmra.mxu1 %vm334_vm1, %v4513_v6  ;;  %3954 = vmatprep.mubr.msk.f32.mxu0 %vm334_vm1, %v6183_v7  ;;  %v1579_v7 = vrot.slane %v5103_v29, 1 }
  0xad   : > { %3904 = vmatprep.mubr.msk.f32.mxu1 %vm334_vm1, %v4545_v31 }
  0xaf   : > { %3955 = vmatmul.mubr.msk.f32.gmra.mxu0 %vm334_vm1, %v6184_v23  ;;  %v5131_v23 = vsel %vm253_vm0, %v1579_v7, %v1580_v22 }
  0xb0   : > { %3905 = vmatmul.mubr.msk.f32.gmra.mxu1 %vm334_vm1, %v4548_v32  ;;  %3957 = vmatprep.mubr.msk.f32.mxu0 %vm334_vm1, %v4661_v44  ;;  %v1582_v44 = vrot.slane %v5119_v52, 1  ;;  %6185 = vst [vmem:[#allocation26_spill] sm:$0xff] %v5131_v23 }
  0xb1   : > { %3907 = vmatprep.mubr.msk.f32.mxu1 %vm334_vm1, %v4589_v11 }
  0xb3   : > { %3958 = vmatmul.mubr.msk.f32.gmra.mxu0 %vm334_vm1, %v4682_v62  ;;  %v5140_v62 = vsel %vm253_vm0, %v1580_v22, %v1582_v44  ;;  %v6197_v22 = vld [vmem:[#allocation47_spill] sm:$0xff] }
  0xb4   : > { %3908 = vmatmul.mubr.msk.f32.gmra.mxu1 %vm334_vm1, %v6159_v0  ;;  %3960 = vmatprep.mubr.msk.f32.mxu0 %vm334_vm1, %v4690_v43  ;;  %6186 = vst [vmem:[#allocation7_spill] sm:$0xff] %v5140_v62 }
  0xb5   : > { %3910 = vmatprep.mubr.msk.f32.mxu1 %vm334_vm1, %v4633_v51 }
  0xb7   : > { %3961 = vmatmul.mubr.msk.f32.gmra.mxu0 %vm334_vm1, %v4705_v36  ;;  %v5315_v36 = vld [vmem:[%s4348_s3 + $0x198] sm:$0xff] }
  0xb8   : > { %3911 = vmatmul.mubr.msk.f32.gmra.mxu1 %vm334_vm1, %v6160_v16  ;;  %3963 = vmatprep.mubr.msk.f32.mxu0 %vm334_vm1, %v5131_v23 }
  0xb9   : > { %3913 = vmatprep.mubr.msk.f32.mxu1 %vm334_vm1, %v5103_v29 }
  0xbb   : > { %3964 = vmatmul.mubr.msk.f32.gmra.mxu0 %vm334_vm1, %v5140_v62 }
  0xbc   : > { %3914 = vmatmul.mubr.msk.f32.gmra.mxu1 %vm334_vm1, %v5106_v41  ;;  %4018 = vmatprep.mubr.msk.f32.mxu0 %vm334_vm1, %v4421_v33  ;;  %v6187_v33 = vld [vmem:[#allocation37_spill] sm:$0xff] }
  0xbd   : > { %3968 = vmatprep.mubr.msk.f32.mxu1 %vm334_vm1, %v4723_v18 }
  0xbf   : > { %4019 = vmatmul.mubr.msk.f32.vlgmr.msra.gmra.mxu0 %vm334_vm1, %v4424_v34  ;;  %v6188_v34 = vld [vmem:[#allocation38_spill] sm:$0xff] }
  0xc0   : > { %3969 = vmatmul.mubr.msk.f32.vlgmr.msra.gmra.mxu1 %vm334_vm1, %v4734_v3  ;;  %4117 = vmatpush3.msra.mxu0 %v5005_v27 }
  0xc1   : > { %4067 = vmatpush3.msra.mxu1 %v4997_v57  ;;  %3971 = vmatprep.mubr.msk.f32.mxu1 %vm334_vm1, %v4746_v12  ;;  %v1845_v57 = vrot.slane %v5103_v29, 2 }
  0xc2   : > { %4021 = vmatprep.mubr.msk.f32.mxu0 %vm334_vm1, %v4459_v47  ;;  %v6189_v47 = vld [vmem:[#allocation39_spill] sm:$0xff] }
  0xc3   : > { %4022 = vmatmul.mubr.msk.f32.gmra.mxu0 %vm334_vm1, %v4462_v48  ;;  %v6190_v48 = vld [vmem:[#allocation40_spill] sm:$0xff] }
  0xc4   : > { %3972 = vmatmul.mubr.msk.f32.gmra.mxu1 %vm334_vm1, %v4761_v21  ;;  %4024 = vmatprep.mubr.msk.f32.mxu0 %vm334_vm1, %v4479_v55  ;;  %v6191_v55 = vld [vmem:[#allocation41_spill] sm:$0xff] }
  0xc5   : > { %3974 = vmatprep.mubr.msk.f32.mxu1 %vm334_vm1, %v4767_v10 }
  0xc7   : > { %4025 = vmatmul.mubr.msk.f32.gmra.mxu0 %vm334_vm1, %v4494_v61 }
  0xc8   : > { %3975 = vmatmul.mubr.msk.f32.gmra.mxu1 %vm334_vm1, %v4778_v60  ;;  %4027 = vmatprep.mubr.msk.f32.mxu0 %vm334_vm1, %v4537_v25  ;;  %v6193_v25 = vld [vmem:[#allocation43_spill] sm:$0xff] }
  0xc9   : > { %3977 = vmatprep.mubr.msk.f32.mxu1 %vm334_vm1, %v4784_v49 }
  0xcb   : > { %4028 = vmatmul.mubr.msk.f32.gmra.mxu0 %vm334_vm1, %v4540_v30  ;;  %v6194_v30 = vld [vmem:[#allocation44_spill] sm:$0xff] }
  0xcc   : > { %3978 = vmatmul.mubr.msk.f32.gmra.mxu1 %vm334_vm1, %v6187_v33  ;;  %4030 = vmatprep.mubr.msk.f32.mxu0 %vm334_vm1, %v4581_v59 }
  0xcd   : > { %3980 = vmatprep.mubr.msk.f32.mxu1 %vm334_vm1, %v4801_v28 }
  0xcf   : > { %4031 = vmatmul.mubr.msk.f32.gmra.mxu0 %vm334_vm1, %v4584_v1 }
  0xd0   : > { %3981 = vmatmul.mubr.msk.f32.gmra.mxu1 %vm334_vm1, %v6188_v34  ;;  %4033 = vmatprep.mubr.msk.f32.mxu0 %vm334_vm1, %v4625_v24  ;;  %v6195_v24 = vld [vmem:[#allocation45_spill] sm:$0xff] }
  0xd1   : > { %3983 = vmatprep.mubr.msk.f32.mxu1 %vm334_vm1, %v4818_v37 }
  0xd3   : > { %4034 = vmatmul.mubr.msk.f32.gmra.mxu0 %vm334_vm1, %v4628_v40  ;;  %v6196_v40 = vld [vmem:[#allocation46_spill] sm:$0xff] }
  0xd4   : > { %3984 = vmatmul.mubr.msk.f32.gmra.mxu1 %vm334_vm1, %v6189_v47  ;;  %4036 = vmatprep.mubr.msk.f32.mxu0 %vm334_vm1, %v4357_v5 }
  0xd5   : > { %3986 = vmatprep.mubr.msk.f32.mxu1 %vm334_vm1, %v4835_v4 }
  0xd7   : > { %4037 = vmatmul.mubr.msk.f32.gmra.mxu0 %vm334_vm1, %v4362_v8 }
  0xd8   : > { %3987 = vmatmul.mubr.msk.f32.gmra.mxu1 %vm334_vm1, %v6190_v48  ;;  %4039 = vmatprep.mubr.msk.f32.mxu0 %vm334_vm1, %v4383_v19  ;;  %v6192_v19 = vld [vmem:[#allocation42_spill] sm:$0xff] }
  0xd9   : > { %3989 = vmatprep.mubr.msk.f32.mxu1 %vm334_vm1, %v4852_v45 }
  0xdb   : > { %4040 = vmatmul.mubr.msk.f32.gmra.mxu0 %vm334_vm1, %v4386_v20 }
  0xdc   : > { %3990 = vmatmul.mubr.msk.f32.gmra.mxu1 %vm334_vm1, %v6191_v55  ;;  %4042 = vmatprep.mubr.msk.f32.mxu0 %vm334_vm1, %v4427_v35 }
  0xdd   : > { %3992 = vmatprep.mubr.msk.f32.mxu1 %vm334_vm1, %v4869_v26 }
  0xdf   : > { %v5218_v5 = vpop.f32.mrf.mxu0  ;;  %4043 = vmatmul.mubr.msk.f32.gmra.mxu0 %vm334_vm1, %v4437_v39 }
  0xe0   : > { %v5222_v8 = vpop.f32.mrf.mxu1  ;;  %3993 = vmatmul.mubr.msk.f32.gmra.mxu1 %vm334_vm1, %v6192_v19  ;;  %4045 = vmatprep.mubr.msk.f32.mxu0 %vm334_vm1, %v4473_v53 }
  0xe1   : > { %v5228_v20 = vpop.f32.mrf.mxu0  ;;  %3995 = vmatprep.mubr.msk.f32.mxu1 %vm334_vm1, %v4886_v42 }
  0xe2   : > { %v5232_v35 = vpop.f32.mrf.mxu1 }
  0xe3   : > { %v5234_v61 = vpop.f32.mrf.mxu0  ;;  %4046 = vmatmul.mubr.msk.f32.gmra.mxu0 %vm334_vm1, %v4476_v54 }
  0xe4   : > { %v5238_v39 = vpop.f32.mrf.mxu1  ;;  %3996 = vmatmul.mubr.msk.f32.gmra.mxu1 %vm334_vm1, %v6193_v25  ;;  %4048 = vmatprep.mubr.msk.f32.mxu0 %vm334_vm1, %v4510_v2 }
  0xe5   : > { %v5244_v53 = vpop.f32.mrf.mxu0  ;;  %3998 = vmatprep.mubr.msk.f32.mxu1 %vm334_vm1, %v6194_v30 }
  0xe6   : > { %v5248_v59 = vpop.f32.mrf.mxu1 }
  0xe7   : > { %v5250_v1 = vpop.f32.mrf.mxu0  ;;  %4049 = vmatmul.mubr.msk.f32.gmra.mxu0 %vm334_vm1, %v4513_v6 }
  0xe8   : > { %v5254_v54 = vpop.f32.mrf.mxu1  ;;  %3999 = vmatmul.mubr.msk.f32.gmra.mxu1 %vm334_vm1, %v6195_v24  ;;  %4051 = vmatprep.mubr.msk.f32.mxu0 %vm334_vm1, %v4545_v31 }
  0xe9   : > { %v5260_v2 = vpop.f32.mrf.mxu0  ;;  %4001 = vmatprep.mubr.msk.f32.mxu1 %vm334_vm1, %v6196_v40 }
  0xea   : > { %v5264_v7 = vpop.f32.mrf.mxu1 }
  0xeb   : > { %v5266_v44 = vpop.f32.mrf.mxu0  ;;  %4052 = vmatmul.mubr.msk.f32.gmra.mxu0 %vm334_vm1, %v4548_v32 }
  0xec   : > { %v5270_v6 = vpop.f32.mrf.mxu1  ;;  %4002 = vmatmul.mubr.msk.f32.gmra.mxu1 %vm334_vm1, %v6197_v22  ;;  %4054 = vmatprep.mubr.msk.f32.mxu0 %vm334_vm1, %v4589_v11 }
  0xed   : > { %v5276_v31 = vpop.f32.mrf.mxu0  ;;  %4004 = vmatprep.mubr.msk.f32.mxu1 %vm334_vm1, %v4937_v38 }
  0xee   : > { %v5280_v18 = vpop.f32.mrf.mxu1 }
  0xef   : > { %v5282_v3 = vpop.f32.mrf.mxu0  ;;  %4055 = vmatmul.mubr.msk.f32.gmra.mxu0 %vm334_vm1, %v6159_v0  ;;  %v1846_v0 = vrot.slane %v5106_v41, 2 }
  0xf0   : > { %v5286_v32 = vpop.f32.mrf.mxu1  ;;  %4005 = vmatmul.mubr.msk.f32.gmra.mxu1 %vm334_vm1, %v4948_v58  ;;  %4057 = vmatprep.mubr.msk.f32.mxu0 %vm334_vm1, %v4633_v51 }
  0xf1   : > { %6198 = vst [vmem:[#allocation9_spill] sm:$0xff] %v5286_v32  ;;  %v5292_v11 = vpop.f32.mrf.mxu0  ;;  %4007 = vmatprep.mubr.msk.f32.mxu1 %vm334_vm1, %v4954_v56  ;;  %v5334_v32 = vld [vmem:[%s4348_s3 + $0x1a0] sm:$0xff] }
  0xf2   : > { %v5297_v27 = vpop.f32.mrf.mxu1 }
  0xf3   : > { %6199 = vst [vmem:[#allocation11_spill] sm:$0xff] %v5297_v27  ;;  %v5300_v62 = vpop.f32.mrf.mxu0  ;;  %4058 = vmatmul.mubr.msk.f32.gmra.mxu0 %vm334_vm1, %v6160_v16  ;;  %v1848_v27 = vrot.slane %v5119_v52, 2  ;;  %v5321_v16 = vsel %vm913_vm2, %v1845_v57, %v1846_v0 }
  0xf4   : > { %v5304_v23 = vpop.f32.mrf.mxu1  ;;  %4008 = vmatmul.mubr.msk.f32.gmra.mxu1 %vm334_vm1, %v4965_v63  ;;  %4060 = vmatprep.mubr.msk.f32.mxu0 %vm334_vm1, %v5103_v29  ;;  %6202 = vst [vmem:[#allocation17_spill] sm:$0xff] %v5321_v16 }
  0xf5   : > { %6200 = vst [vmem:[#allocation13_spill] sm:$0xff] %v5304_v23  ;;  %v5310_v51 = vpop.f32.mrf.mxu0  ;;  %4010 = vmatprep.mubr.msk.f32.mxu1 %vm334_vm1, %v4971_v13  ;;  %v5341_v57 = vsel %vm913_vm2, %v1846_v0, %v1848_v27 }
  0xf6   : > { %v5318_v43 = vpop.f32.mrf.mxu1  ;;  %6204 = vst [vmem:[#allocation37_spill] sm:$0xff] %v5341_v57 }
  0xf7   : > { %6201 = vst [vmem:[#allocation15_spill] sm:$0xff] %v5318_v43  ;;  %v5323_v23 = vpop.f32.mrf.mxu0  ;;  %4061 = vmatmul.mubr.msk.f32.gmra.mxu0 %vm334_vm1, %v5106_v41 }
  0xf8   : > { %v5327_v29 = vpop.f32.mrf.mxu1  ;;  %4011 = vmatmul.mubr.msk.f32.gmra.mxu1 %vm334_vm1, %v4980_v15  ;;  %4063 = vmatprep.mubr.msk.f32.mxu0 %vm334_vm1, %v5315_v36 }
  0xf9   : > { %6203 = vst [vmem:[#allocation22_spill] sm:$0xff] %v5327_v29  ;;  %v5336_v52 = vpop.f32.mrf.mxu0  ;;  %4013 = vmatprep.mubr.msk.f32.mxu1 %vm334_vm1, %v5321_v16 }
  0xfa   : > { %v5343_v43 = vpop.f32.mrf.mxu1 }
  0xfb   : > { %6205 = vst [vmem:[#allocation38_spill] sm:$0xff] %v5343_v43  ;;  %v5345_v41 = vpop.f32.mrf.mxu0  ;;  %4064 = vmatmul.mubr.msk.f32.gmra.mxu0 %vm334_vm1, %v5334_v32 }
  0xfc   : > { %v5349_v29 = vpop.f32.mrf.mxu1  ;;  %4014 = vmatmul.mubr.msk.f32.gmra.mxu1 %vm334_vm1, %v5341_v57  ;;  %4118 = vmatprep.mubr.msk.f32.mxu0 %vm334_vm1, %v4746_v12 }
  0xfd   : > { %6206 = vst [vmem:[#allocation39_spill] sm:$0xff] %v5349_v29  ;;  %v5355_v15 = vpop.f32.mrf.mxu0  ;;  %4068 = vmatprep.mubr.msk.f32.mxu1 %vm334_vm1, %v6164_v14 }
  0xfe   : > { %v5359_v27 = vpop.f32.mrf.mxu1 }
  0xff   : > { %6207 = vst [vmem:[#allocation40_spill] sm:$0xff] %v5359_v27  ;;  %v3820_v0 = vpop.f32.mrf.mxu0  ;;  %4119 = vmatmul.mubr.msk.f32.vlgmr.msra.gmra.mxu0 %vm334_vm1, %v4761_v21 }
 0x100   : > { %v3770_v43 = vpop.f32.mrf.mxu1  ;;  %4069 = vmatmul.mubr.msk.f32.vlgmr.msra.gmra.mxu1 %vm334_vm1, %v6165_v50  ;;  %4121 = vmatprep.mubr.msk.f32.mxu0 %vm334_vm1, %v4767_v10 }
 0x101   : > { %v760_v12 = vadd.f32 %v3770_v43, %v5218_v5  ;;  %v1124_v29 = vpop.f32.mrf.mxu0  ;;  %4071 = vmatprep.mubr.msk.f32.mxu1 %vm334_vm1, %v6166_v17  ;;  %v6208_v17 = vld [vmem:[#allocation19_spill] sm:$0xff] }
 0x102   : > { %v754_v14 = vpop.f32.mrf.mxu1 }
 0x103   : > { %v5370_v57 = vadd.f32 %v3820_v0, %v760_v12  ;;  %v755_v27 = vadd.f32 %v754_v14, %v5228_v20  ;;  %v3823_v16 = vpop.f32.mrf.mxu0  ;;  %4122 = vmatmul.mubr.msk.f32.gmra.mxu0 %vm334_vm1, %v4778_v60  ;;  %v6210_v14 = vld [vmem:[#allocation27_spill] sm:$0xff] }
 0x104   : > { %v3773_v21 = vpop.f32.mrf.mxu1  ;;  %4072 = vmatmul.mubr.msk.f32.gmra.mxu1 %vm334_vm1, %v6167_v9  ;;  %4124 = vmatprep.mubr.msk.f32.mxu0 %vm334_vm1, %v4784_v49 }
 0x105   : > { %v5379_v43 = vadd.f32 %v1124_v29, %v755_v27  ;;  %v770_v10 = vadd.f32 %v3773_v21, %v5234_v61  ;;  %v1134_v50 = vpop.f32.mrf.mxu0  ;;  %4074 = vmatprep.mubr.msk.f32.mxu1 %vm334_vm1, %v6208_v17 }
 0x106   : > { %v764_v5 = vpop.f32.mrf.mxu1 }
 0x107   : > { %v5384_v20 = vadd.f32 %v3823_v16, %v770_v10  ;;  %v765_v60 = vadd.f32 %v764_v5, %v5244_v53  ;;  %v3826_v0 = vpop.f32.mrf.mxu0  ;;  %4125 = vmatmul.mubr.msk.f32.gmra.mxu0 %vm334_vm1, %v6187_v33  ;;  %v6209_v16 = vld [vmem:[#allocation24_spill] sm:$0xff]  ;;  %v6211_v10 = vld [vmem:[#allocation29_spill] sm:$0xff] }
 0x108   : > { %v3776_v9 = vpop.f32.mrf.mxu1  ;;  %4075 = vmatmul.mubr.msk.f32.gmra.mxu1 %vm334_vm1, %v6169_v46  ;;  %4127 = vmatprep.mubr.msk.f32.mxu0 %vm334_vm1, %v4801_v28 }
 0x109   : > { %v5393_v49 = vadd.f32 %v1134_v50, %v765_v60  ;;  %v780_v61 = vadd.f32 %v3776_v9, %v5250_v1  ;;  %v1144_v29 = vpop.f32.mrf.mxu0  ;;  %4077 = vmatprep.mubr.msk.f32.mxu1 %vm334_vm1, %v6209_v16  ;;  %v6212_v60 = vld [vmem:[#allocation31_spill] sm:$0xff]  ;;  %v6213_v9 = vld [vmem:[#allocation33_spill] sm:$0xff] }
 0x10a   : > { %v774_v53 = vpop.f32.mrf.mxu1 }
 0x10b   : > { %v5398_v27 = vadd.f32 %v3826_v0, %v780_v61  ;;  %v775_v33 = vadd.f32 %v774_v53, %v5260_v2  ;;  %v3829_v12 = vpop.f32.mrf.mxu0  ;;  %4128 = vmatmul.mubr.msk.f32.gmra.mxu0 %vm334_vm1, %v6188_v34  ;;  %v6214_v53 = vld [vmem:[#allocation35_spill] sm:$0xff] }
 0x10c   : > { %v3779_v46 = vpop.f32.mrf.mxu1  ;;  %4078 = vmatmul.mubr.msk.f32.gmra.mxu1 %vm334_vm1, %v6210_v14  ;;  %4130 = vmatprep.mubr.msk.f32.mxu0 %vm334_vm1, %v4818_v37 }
 0x10d   : > { %v5407_v28 = vadd.f32 %v1144_v29, %v775_v33  ;;  %v790_v1 = vadd.f32 %v3779_v46, %v5266_v44  ;;  %v1154_v21 = vpop.f32.mrf.mxu0  ;;  %4080 = vmatprep.mubr.msk.f32.mxu1 %vm334_vm1, %v6211_v10 }
 0x10e   : > { %v784_v2 = vpop.f32.mrf.mxu1 }
 0x10f   : > { %v5412_v50 = vadd.f32 %v3829_v12, %v790_v1  ;;  %v785_v34 = vadd.f32 %v784_v2, %v5276_v31  ;;  %v3832_v17 = vpop.f32.mrf.mxu0  ;;  %4131 = vmatmul.mubr.msk.f32.gmra.mxu0 %vm334_vm1, %v6189_v47  ;;  %v6215_v12 = vld [vmem:[#allocation5_spill] sm:$0xff]  ;;  %v6217_v2 = vld [vmem:[#allocation8_spill] sm:$0xff] }
 0x110   : > { %v3782_v5 = vpop.f32.mrf.mxu1  ;;  %4081 = vmatmul.mubr.msk.f32.gmra.mxu1 %vm334_vm1, %v6212_v60  ;;  %4133 = vmatprep.mubr.msk.f32.mxu0 %vm334_vm1, %v4835_v4  ;;  %v6218_v60 = vld [vmem:[#allocation10_spill] sm:$0xff] }
 0x111   : > { %v5421_v37 = vadd.f32 %v1154_v21, %v785_v34  ;;  %v800_v44 = vadd.f32 %v3782_v5, %v5282_v3  ;;  %v1164_v0 = vpop.f32.mrf.mxu0  ;;  %4083 = vmatprep.mubr.msk.f32.mxu1 %vm334_vm1, %v6213_v9  ;;  %v6216_v21 = vld [vmem:[#allocation6_spill] sm:$0xff] }
 0x112   : > { %v794_v31 = vpop.f32.mrf.mxu1 }
 0x113   : > { %v5426_v61 = vadd.f32 %v3832_v17, %v800_v44  ;;  %v795_v47 = vadd.f32 %v794_v31, %v5292_v11  ;;  %v3835_v29 = vpop.f32.mrf.mxu0  ;;  %4134 = vmatmul.mubr.msk.f32.gmra.mxu0 %vm334_vm1, %v6190_v48 }
 0x114   : > { %v3785_v16 = vpop.f32.mrf.mxu1  ;;  %4084 = vmatmul.mubr.msk.f32.gmra.mxu1 %vm334_vm1, %v6214_v53  ;;  %4136 = vmatprep.mubr.msk.f32.mxu0 %vm334_vm1, %v4852_v45  ;;  %v6221_v53 = vld [vmem:[#allocation16_spill] sm:$0xff] }
 0x115   : > { %v5435_v4 = vadd.f32 %v1164_v0, %v795_v47  ;;  %v810_v3 = vadd.f32 %v3785_v16, %v5300_v62  ;;  %v1174_v33 = vpop.f32.mrf.mxu0  ;;  %4086 = vmatprep.mubr.msk.f32.mxu1 %vm334_vm1, %v6215_v12  ;;  %v6219_v0 = vld [vmem:[#allocation12_spill] sm:$0xff] }
 0x116   : > { %v804_v11 = vpop.f32.mrf.mxu1 }
 0x117   : > { %v5440_v46 = vadd.f32 %v3835_v29, %v810_v3  ;;  %v805_v48 = vadd.f32 %v804_v11, %v5310_v51  ;;  %v3838_v14 = vpop.f32.mrf.mxu0  ;;  %4137 = vmatmul.mubr.msk.f32.gmra.mxu0 %vm334_vm1, %v6191_v55  ;;  %v6220_v29 = vld [vmem:[#allocation14_spill] sm:$0xff] }
 0x118   : > { %v3788_v1 = vpop.f32.mrf.mxu1  ;;  %4087 = vmatmul.mubr.msk.f32.gmra.mxu1 %vm334_vm1, %v6216_v21  ;;  %4139 = vmatprep.mubr.msk.f32.mxu0 %vm334_vm1, %v4869_v26  ;;  %v6222_v11 = vld [vmem:[#allocation18_spill] sm:$0xff] }
 0x119   : > { %v5449_v62 = vadd.f32 %v1174_v33, %v805_v48  ;;  %v820_v45 = vadd.f32 %v3788_v1, %v5323_v23  ;;  %v1184_v10 = vpop.f32.mrf.mxu0  ;;  %4089 = vmatprep.mubr.msk.f32.mxu1 %vm334_vm1, %v6217_v2 }
 0x11a   : > { %v814_v51 = vpop.f32.mrf.mxu1 }
 0x11b   : > { %v5454_v34 = vadd.f32 %v3838_v14, %v820_v45  ;;  %v815_v55 = vadd.f32 %v814_v51, %v5336_v52  ;;  %v3841_v17 = vpop.f32.mrf.mxu0  ;;  %4140 = vmatmul.mubr.msk.f32.gmra.mxu0 %vm334_vm1, %v6192_v19  ;;  %v6223_v14 = vld [vmem:[#allocation20_spill] sm:$0xff]  ;;  %v6225_v51 = vld [vmem:[#allocation25_spill] sm:$0xff] }
 0x11c   : > { %v3791_v5 = vpop.f32.mrf.mxu1  ;;  %4090 = vmatmul.mubr.msk.f32.gmra.mxu1 %vm334_vm1, %v6218_v60  ;;  %4142 = vmatprep.mubr.msk.f32.mxu0 %vm334_vm1, %v4886_v42  ;;  %v6226_v60 = vld [vmem:[#allocation28_spill] sm:$0xff] }
 0x11d   : > { %v5463_v26 = vadd.f32 %v1184_v10, %v815_v55  ;;  %v830_v23 = vadd.f32 %v3791_v5, %v5345_v41  ;;  %v1194_v44 = vpop.f32.mrf.mxu0  ;;  %4092 = vmatprep.mubr.msk.f32.mxu1 %vm334_vm1, %v6219_v0  ;;  %v6224_v10 = vld [vmem:[#allocation23_spill] sm:$0xff] }
 0x11e   : > { %v824_v52 = vpop.f32.mrf.mxu1 }
 0x11f   : > { %v5468_v9 = vadd.f32 %v3841_v17, %v830_v23  ;;  %v825_v19 = vadd.f32 %v824_v52, %v5355_v15  ;;  %v3844_v31 = vpop.f32.mrf.mxu0  ;;  %4143 = vmatmul.mubr.msk.f32.gmra.mxu0 %vm334_vm1, %v6193_v25 }
 0x120   : > { %v3794_v47 = vpop.f32.mrf.mxu1  ;;  %4093 = vmatmul.mubr.msk.f32.gmra.mxu1 %vm334_vm1, %v6220_v29  ;;  %4145 = vmatprep.mubr.msk.f32.mxu0 %vm334_vm1, %v6194_v30  ;;  %v6229_v29 = vld [vmem:[#allocation9_spill] sm:$0xff] }
 0x121   : > { %v5477_v42 = vadd.f32 %v1194_v44, %v825_v19  ;;  %v840_v41 = vadd.f32 %v3794_v47, %v5222_v8  ;;  %v1204_v16 = vpop.f32.mrf.mxu0  ;;  %4095 = vmatprep.mubr.msk.f32.mxu1 %vm334_vm1, %v6221_v53  ;;  %v6227_v44 = vld [vmem:[#allocation30_spill] sm:$0xff]  ;;  %v2375_v53 = vrot.slane %v5315_v36, 1 }
 0x122   : > { %v834_v15 = vpop.f32.mrf.mxu1 }
 0x123   : > { %v5482_v3 = vadd.f32 %v3844_v31, %v840_v41  ;;  %v835_v25 = vadd.f32 %v834_v15, %v5232_v35  ;;  %v3847_v33 = vpop.f32.mrf.mxu0  ;;  %4146 = vmatmul.mubr.msk.f32.gmra.mxu0 %vm334_vm1, %v6195_v24  ;;  %v2642_v31 = vrot.slane %v5334_v32, 2  ;;  %v2376_v15 = vrot.slane %v5334_v32, 1  ;;  %v6235_v32 = vld [vmem:[#allocation13_spill] sm:$0xff] }
 0x124   : > { %v3797_v12 = vpop.f32.mrf.mxu1  ;;  %4096 = vmatmul.mubr.msk.f32.gmra.mxu1 %vm334_vm1, %v6222_v11  ;;  %4148 = vmatprep.mubr.msk.f32.mxu0 %vm334_vm1, %v6196_v40 }
 0x125   : > { %v5491_v8 = vadd.f32 %v1204_v16, %v835_v25  ;;  %v850_v30 = vadd.f32 %v3797_v12, %v5238_v39  ;;  %v1214_v48 = vpop.f32.mrf.mxu0  ;;  %4098 = vmatprep.mubr.msk.f32.mxu1 %vm334_vm1, %v6223_v14  ;;  %v6230_v16 = vld [vmem:[#allocation34_spill] sm:$0xff]  ;;  %v6233_v14 = vld [vmem:[#allocation36_spill] sm:$0xff] }
 0x126   : > { %v844_v35 = vpop.f32.mrf.mxu1 }
 0x127   : > { %v5496_v1 = vadd.f32 %v3847_v33, %v850_v30  ;;  %v845_v24 = vadd.f32 %v844_v35, %v5248_v59  ;;  %v3850_v21 = vpop.f32.mrf.mxu0  ;;  %4149 = vmatmul.mubr.msk.f32.gmra.mxu0 %vm334_vm1, %v6197_v22  ;;  %v6232_v30 = vld [vmem:[#allocation21_spill] sm:$0xff] }
 0x128   : > { %v3800_v45 = vpop.f32.mrf.mxu1  ;;  %4099 = vmatmul.mubr.msk.f32.gmra.mxu1 %vm334_vm1, %v6224_v10  ;;  %4151 = vmatprep.mubr.msk.f32.mxu0 %vm334_vm1, %v4937_v38  ;;  %v6234_v35 = vld [vmem:[#allocation17_spill] sm:$0xff]  ;;  %v6236_v10 = vld [vmem:[#allocation26_spill] sm:$0xff] }
 0x129   : > { %v5505_v39 = vadd.f32 %v1214_v48, %v845_v24  ;;  %v860_v40 = vadd.f32 %v3800_v45, %v5254_v54  ;;  %v1224_v2 = vpop.f32.mrf.mxu0  ;;  %4101 = vmatprep.mubr.msk.f32.mxu1 %vm334_vm1, %v6225_v51 }
 0x12a   : > { %v854_v59 = vpop.f32.mrf.mxu1 }
 0x12b   : > { %v5510_v55 = vadd.f32 %v3850_v21, %v860_v40  ;;  %v855_v22 = vadd.f32 %v854_v59, %v5264_v7  ;;  %v3853_v17 = vpop.f32.mrf.mxu0  ;;  %4152 = vmatmul.mubr.msk.f32.gmra.mxu0 %vm334_vm1, %v4948_v58  ;;  %v2377_v59 = vsel %vm253_vm0, %v2375_v53, %v2376_v15 }
 0x12c   : > { %v3803_v5 = vpop.f32.mrf.mxu1  ;;  %4102 = vmatmul.mubr.msk.f32.gmra.mxu1 %vm334_vm1, %v6226_v60  ;;  %4154 = vmatprep.mubr.msk.f32.mxu0 %vm334_vm1, %v4954_v56  ;;  %v6228_v56 = vld [vmem:[#allocation32_spill] sm:$0xff] }
 0x12d   : > { %v5519_v38 = vadd.f32 %v1224_v2, %v855_v22  ;;  %v870_v54 = vadd.f32 %v3803_v5, %v5270_v6  ;;  %v1234_v23 = vpop.f32.mrf.mxu0  ;;  %4104 = vmatprep.mubr.msk.f32.mxu1 %vm334_vm1, %v6227_v44  ;;  %v2641_v6 = vrot.slane %v5315_v36, 2  ;;  %v6239_v44 = vld [vmem:[#allocation7_spill] sm:$0xff] }
 0x12e   : > { %v864_v7 = vpop.f32.mrf.mxu1 }
 0x12f   : > { %v5524_v0 = vadd.f32 %v3853_v17, %v870_v54  ;;  %v865_v58 = vadd.f32 %v864_v7, %v5280_v18  ;;  %v3856_v52 = vpop.f32.mrf.mxu0  ;;  %4155 = vmatmul.mubr.msk.f32.gmra.mxu0 %vm334_vm1, %v4965_v63  ;;  %v195_v63 = vld [vmem:[%s4348_s3 + $0x1a8] sm:$0x3]  ;;  %v2643_v40 = vsel %vm913_vm2, %v2641_v6, %v2642_v31  ;;  %v6237_v17 = vld [vmem:[#allocation15_spill] sm:$0xff] }
 0x130   : > { %v3806_v19 = vpop.f32.mrf.mxu1  ;;  %4105 = vmatmul.mubr.msk.f32.gmra.mxu1 %vm334_vm1, %v6228_v56  ;;  %4157 = vmatprep.mubr.msk.f32.mxu0 %vm334_vm1, %v4971_v13  ;;  %v6231_v13 = vld [vmem:[#allocation11_spill] sm:$0xff]  ;;  %v2644_v24 = vrot.slane %v195_v63, 2  ;;  %v2378_v2 = vrot.slane %v195_v63, 1  ;;  %v6238_v54 = vld [vmem:[#allocation37_spill] sm:$0xff] }
 0x131   : > { %v5535_v47 = vadd.f32 %v1234_v23, %v865_v58  ;;  %v880_v41 = vadd.f32 %v3806_v19, %v6229_v29  ;;  %v1244_v18 = vpop.f32.mrf.mxu0  ;;  %4107 = vmatprep.mubr.msk.f32.mxu1 %vm334_vm1, %v6230_v16 }
 0x132   : > { %v874_v25 = vpop.f32.mrf.mxu1  ;;  %v2645_v7 = vsel %vm913_vm2, %v2642_v31, %v2644_v24  ;;  %v2379_v6 = vsel %vm253_vm0, %v2376_v15, %v2378_v2  ;;  %v6243_v15 = vld [vmem:[#allocation40_spill] sm:$0xff] }
 0x133   : > { %v5543_v33 = vadd.f32 %v3856_v52, %v880_v41  ;;  %v875_v12 = vadd.f32 %v874_v25, %v6231_v13  ;;  %v3859_v11 = vpop.f32.mrf.mxu0  ;;  %4158 = vmatmul.mubr.msk.f32.gmra.mxu0 %vm334_vm1, %v6232_v30  ;;  %v6240_v52 = vld [vmem:[#allocation22_spill] sm:$0xff]  ;;  %v6242_v25 = vld [vmem:[#allocation39_spill] sm:$0xff] }
 0x134   : > { %v3809_v48 = vpop.f32.mrf.mxu1  ;;  %4108 = vmatmul.mubr.msk.f32.gmra.mxu1 %vm334_vm1, %v6233_v14  ;;  %4160 = vmatprep.mubr.msk.f32.mxu0 %vm334_vm1, %v6234_v35 }
 0x135   : > { %v5552_v36 = vadd.f32 %v1244_v18, %v875_v12  ;;  %v890_v21 = vadd.f32 %v3809_v48, %v6235_v32  ;;  %v1254_v45 = vpop.f32.mrf.mxu0  ;;  %4110 = vmatprep.mubr.msk.f32.mxu1 %vm334_vm1, %v6236_v10  ;;  %v6241_v18 = vld [vmem:[#allocation38_spill] sm:$0xff] }
 0x136   : > { %v884_v51 = vpop.f32.mrf.mxu1 }
 0x137   : > { %v5559_v22 = vadd.f32 %v3859_v11, %v890_v21  ;;  %v885_v5 = vadd.f32 %v884_v51, %v6237_v17  ;;  %v3862_v60 = vpop.f32.mrf.mxu0  ;;  %4161 = vmatmul.mubr.msk.f32.gmra.mxu0 %vm334_vm1, %v6238_v54 }
 0x138   : > { %v3812_v23 = vpop.f32.mrf.mxu1  ;;  %4111 = vmatmul.mubr.msk.f32.gmra.mxu1 %vm334_vm1, %v6239_v44  ;;  %4163 = vmatprep.mubr.msk.f32.mxu0 %vm334_vm1, %v2643_v40 }
 0x139   : > { %v5568_v58 = vadd.f32 %v1254_v45, %v885_v5  ;;  %v900_v19 = vadd.f32 %v3812_v23, %v6240_v52  ;;  %v1264_v56 = vpop.f32.mrf.mxu0  ;;  %4113 = vmatprep.mubr.msk.f32.mxu1 %vm334_vm1, %v2377_v59 }
 0x13a   : > { %v894_v29 = vpop.f32.mrf.mxu1 }
 0x13b   : > { %v5573_v41 = vadd.f32 %v3862_v60, %v900_v19  ;;  %v895_v16 = vadd.f32 %v894_v29, %v6241_v18  ;;  %v3865_v63 = vpop.f32.mrf.mxu0  ;;  %4164 = vmatmul.mubr.msk.f32.gmra.mxu0 %vm334_vm1, %v2645_v7 }
 0x13c   : > { %v3815_v53 = vpop.f32.mrf.mxu1  ;;  %4114 = vmatmul.mubr.msk.f32.gmra.mxu1 %vm334_vm1, %v2379_v6 }
 0x13d   : > { %v5578_v31 = vadd.f32 %v1264_v56, %v895_v16  ;;  %v910_v13 = vadd.f32 %v3815_v53, %v6242_v25  ;;  %v1274_v12 = vpop.f32.mrf.mxu0 }
 0x13e   : > { %v904_v11 = vpop.f32.mrf.mxu1 }
 0x13f   : > { %v5581_v30 = vadd.f32 %v3865_v63, %v910_v13  ;;  %v905_v48 = vadd.f32 %v904_v11, %v6243_v15  ;;  %v3920_v14 = vpop.f32.mrf.mxu0 }
 0x140   : > { %v3870_v35 = vpop.f32.mrf.mxu1 }
 0x141   : > { %v5584_v24 = vadd.f32 %v1274_v12, %v905_v48  ;;  %v1547_v32 = vadd.f32 %v3870_v35, %v5370_v57  ;;  %v1654_v21 = vpop.f32.mrf.mxu0 }
 0x142   : > { %v1387_v45 = vpop.f32.mrf.mxu1 }
 0x143   : > { %v5587_v10 = vadd.f32 %v3920_v14, %v1547_v32  ;;  %v1546_v40 = vadd.f32 %v1387_v45, %v5379_v43  ;;  %v3923_v2 = vpop.f32.mrf.mxu0 }
 0x144   : > { %v3873_v51 = vpop.f32.mrf.mxu1 }
 0x145   : > { %v5590_v59 = vadd.f32 %v1654_v21, %v1546_v40  ;;  %v1549_v17 = vadd.f32 %v3873_v51, %v5384_v20  ;;  %v1664_v5 = vpop.f32.mrf.mxu0 }
 0x146   : > { %v1397_v60 = vpop.f32.mrf.mxu1 }
 0x147   : > { %v5593_v54 = vadd.f32 %v3923_v2, %v1549_v17  ;;  %v1548_v23 = vadd.f32 %v1397_v60, %v5393_v49  ;;  %v3926_v44 = vpop.f32.mrf.mxu0 }
 0x148   : > { %v3876_v57 = vpop.f32.mrf.mxu1 }
 0x149   : > { %v5596_v7 = vadd.f32 %v1664_v5, %v1548_v23  ;;  %v1551_v52 = vadd.f32 %v3876_v57, %v5398_v27  ;;  %v1674_v19 = vpop.f32.mrf.mxu0 }
 0x14a   : > { %v1407_v43 = vpop.f32.mrf.mxu1 }
 0x14b   : > { %v5599_v56 = vadd.f32 %v3926_v44, %v1551_v52  ;;  %v1550_v6 = vadd.f32 %v1407_v43, %v5407_v28  ;;  %v3929_v29 = vpop.f32.mrf.mxu0 }
 0x14c   : > { %v3879_v20 = vpop.f32.mrf.mxu1 }
 0x14d   : > { %v5602_v18 = vadd.f32 %v1674_v19, %v1550_v6  ;;  %v1553_v16 = vadd.f32 %v3879_v20, %v5412_v50  ;;  %v1684_v63 = vpop.f32.mrf.mxu0 }
 0x14e   : > { %v1417_v49 = vpop.f32.mrf.mxu1 }
 0x14f   : > { %v5605_v53 = vadd.f32 %v3929_v29, %v1553_v16  ;;  %v1552_v25 = vadd.f32 %v1417_v49, %v5421_v37  ;;  %v3932_v13 = vpop.f32.mrf.mxu0 }
 0x150   : > { %v3882_v27 = vpop.f32.mrf.mxu1 }
 0x151   : > { %v5608_v12 = vadd.f32 %v1684_v63, %v1552_v25  ;;  %v1555_v11 = vadd.f32 %v3882_v27, %v5426_v61  ;;  %v1694_v15 = vpop.f32.mrf.mxu0 }
 0x152   : > { %v1427_v28 = vpop.f32.mrf.mxu1 }
 0x153   : > { %v5611_v48 = vadd.f32 %v3932_v13, %v1555_v11  ;;  %v1554_v14 = vadd.f32 %v1427_v28, %v5435_v4  ;;  %v3935_v35 = vpop.f32.mrf.mxu0 }
 0x154   : > { %v3885_v50 = vpop.f32.mrf.mxu1 }
 0x155   : > { %v5614_v32 = vadd.f32 %v1694_v15, %v1554_v14  ;;  %v1557_v21 = vadd.f32 %v3885_v50, %v5440_v46  ;;  %v1704_v45 = vpop.f32.mrf.mxu0 }
 0x156   : > { %v1437_v37 = vpop.f32.mrf.mxu1 }
 0x157   : > { %v5617_v40 = vadd.f32 %v3935_v35, %v1557_v21  ;;  %v1556_v2 = vadd.f32 %v1437_v37, %v5449_v62  ;;  %v3938_v51 = vpop.f32.mrf.mxu0 }
 0x158   : > { %v3888_v61 = vpop.f32.mrf.mxu1 }
 0x159   : > { %v5620_v17 = vadd.f32 %v1704_v45, %v1556_v2  ;;  %v1559_v5 = vadd.f32 %v3888_v61, %v5454_v34  ;;  %v1714_v60 = vpop.f32.mrf.mxu0 }
 0x15a   : > { %v1447_v4 = vpop.f32.mrf.mxu1 }
 0x15b   : > { %v5623_v23 = vadd.f32 %v3938_v51, %v1559_v5  ;;  %v1558_v44 = vadd.f32 %v1447_v4, %v5463_v26  ;;  %v3941_v57 = vpop.f32.mrf.mxu0 }
 0x15c   : > { %v3891_v46 = vpop.f32.mrf.mxu1 }
 0x15d   : > { %v5626_v52 = vadd.f32 %v1714_v60, %v1558_v44  ;;  %v1561_v19 = vadd.f32 %v3891_v46, %v5468_v9  ;;  %v1724_v43 = vpop.f32.mrf.mxu0 }
 0x15e   : > { %v1457_v62 = vpop.f32.mrf.mxu1 }
 0x15f   : > { %v5629_v6 = vadd.f32 %v3941_v57, %v1561_v19  ;;  %v1560_v29 = vadd.f32 %v1457_v62, %v5477_v42  ;;  %v3944_v20 = vpop.f32.mrf.mxu0 }
 0x160   : > { %v3894_v34 = vpop.f32.mrf.mxu1 }
 0x161   : > { %v5632_v16 = vadd.f32 %v1724_v43, %v1560_v29  ;;  %v1563_v63 = vadd.f32 %v3894_v34, %v5482_v3  ;;  %v1734_v49 = vpop.f32.mrf.mxu0 }
 0x162   : > { %v1467_v26 = vpop.f32.mrf.mxu1 }
 0x163   : > { %v5635_v25 = vadd.f32 %v3944_v20, %v1563_v63  ;;  %v1562_v13 = vadd.f32 %v1467_v26, %v5491_v8  ;;  %v3947_v27 = vpop.f32.mrf.mxu0 }
 0x164   : > { %v3897_v9 = vpop.f32.mrf.mxu1 }
 0x165   : > { %v5638_v11 = vadd.f32 %v1734_v49, %v1562_v13  ;;  %v1565_v15 = vadd.f32 %v3897_v9, %v5496_v1  ;;  %v1744_v28 = vpop.f32.mrf.mxu0 }
 0x166   : > { %v1477_v42 = vpop.f32.mrf.mxu1 }
 0x167   : > { %v5641_v14 = vadd.f32 %v3947_v27, %v1565_v15  ;;  %v1564_v35 = vadd.f32 %v1477_v42, %v5505_v39  ;;  %v3950_v50 = vpop.f32.mrf.mxu0 }
 0x168   : > { %v3900_v3 = vpop.f32.mrf.mxu1 }
 0x169   : > { %v5644_v21 = vadd.f32 %v1744_v28, %v1564_v35  ;;  %v1567_v45 = vadd.f32 %v3900_v3, %v5510_v55  ;;  %v1754_v37 = vpop.f32.mrf.mxu0 }
 0x16a   : > { %v1487_v8 = vpop.f32.mrf.mxu1 }
 0x16b   : > { %v5647_v2 = vadd.f32 %v3950_v50, %v1567_v45  ;;  %v1566_v51 = vadd.f32 %v1487_v8, %v5519_v38  ;;  %v3953_v61 = vpop.f32.mrf.mxu0 }
 0x16c   : > { %v3903_v1 = vpop.f32.mrf.mxu1 }
 0x16d   : > { %v5650_v5 = vadd.f32 %v1754_v37, %v1566_v51  ;;  %v1569_v60 = vadd.f32 %v3903_v1, %v5524_v0  ;;  %v1764_v4 = vpop.f32.mrf.mxu0 }
 0x16e   : > { %v1497_v39 = vpop.f32.mrf.mxu1 }
 0x16f   : > { %v5653_v44 = vadd.f32 %v3953_v61, %v1569_v60  ;;  %v1568_v57 = vadd.f32 %v1497_v39, %v5535_v47  ;;  %v3956_v46 = vpop.f32.mrf.mxu0 }
 0x170   : > { %v3906_v55 = vpop.f32.mrf.mxu1 }
 0x171   : > { %v5656_v19 = vadd.f32 %v1764_v4, %v1568_v57  ;;  %v1571_v43 = vadd.f32 %v3906_v55, %v5543_v33  ;;  %v1774_v62 = vpop.f32.mrf.mxu0 }
 0x172   : > { %v1507_v38 = vpop.f32.mrf.mxu1 }
 0x173   : > { %v5659_v29 = vadd.f32 %v3956_v46, %v1571_v43  ;;  %v1570_v20 = vadd.f32 %v1507_v38, %v5552_v36  ;;  %v3959_v34 = vpop.f32.mrf.mxu0 }
 0x174   : > { %v3909_v0 = vpop.f32.mrf.mxu1 }
 0x175   : > { %v5662_v63 = vadd.f32 %v1774_v62, %v1570_v20  ;;  %v1573_v49 = vadd.f32 %v3909_v0, %v5559_v22  ;;  %v1784_v26 = vpop.f32.mrf.mxu0 }
 0x176   : > { %v1517_v47 = vpop.f32.mrf.mxu1 }
 0x177   : > { %6244 = vst [vmem:[#allocation41_spill] sm:$0xff] %v5662_v63  ;;  %v5665_v13 = vadd.f32 %v3959_v34, %v1573_v49  ;;  %v1572_v27 = vadd.f32 %v1517_v47, %v5568_v58  ;;  %v3962_v9 = vpop.f32.mrf.mxu0 }
 0x178   : > { %v3912_v33 = vpop.f32.mrf.mxu1 }
 0x179   : > { %v5668_v15 = vadd.f32 %v1784_v26, %v1572_v27  ;;  %v1575_v28 = vadd.f32 %v3912_v33, %v5573_v41  ;;  %v1794_v42 = vpop.f32.mrf.mxu0 }
 0x17a   : > { %v1527_v36 = vpop.f32.mrf.mxu1 }
 0x17b   : > { %6245 = vst [vmem:[#allocation42_spill] sm:$0xff] %v5668_v15  ;;  %v5671_v35 = vadd.f32 %v3962_v9, %v1575_v28  ;;  %v1574_v50 = vadd.f32 %v1527_v36, %v5578_v31  ;;  %v3965_v3 = vpop.f32.mrf.mxu0 }
 0x17c   : > { %v3915_v22 = vpop.f32.mrf.mxu1 }
 0x17d   : > { %v5674_v45 = vadd.f32 %v1794_v42, %v1574_v50  ;;  %v1577_v37 = vadd.f32 %v3915_v22, %v5581_v30  ;;  %v1804_v8 = vpop.f32.mrf.mxu0 }
 0x17e   : > { %v1537_v58 = vpop.f32.mrf.mxu1 }
 0x17f   : > { %6246 = vst [vmem:[#allocation43_spill] sm:$0xff] %v5674_v45  ;;  %v5677_v51 = vadd.f32 %v3965_v3, %v1577_v37  ;;  %v1576_v61 = vadd.f32 %v1537_v58, %v5584_v24  ;;  %v4020_v1 = vpop.f32.mrf.mxu0 }
 0x180   : > { %v3970_v41 = vpop.f32.mrf.mxu1 }
 0x181   : > { %v5680_v60 = vadd.f32 %v1804_v8, %v1576_v61  ;;  %v2080_v4 = vadd.f32 %v3970_v41, %v5587_v10  ;;  %v5683_v39 = vpop.f32.mrf.mxu0 }
 0x182   : > { %v5685_v31 = vpop.f32.mrf.mxu1 }
 0x183   : > { %6247 = vst [vmem:[#allocation44_spill] sm:$0xff] %v5680_v60  ;;  %v5687_v57 = vadd.f32 %v4020_v1, %v2080_v4  ;;  %v4023_v46 = vpop.f32.mrf.mxu0 }
 0x184   : > { %v3973_v30 = vpop.f32.mrf.mxu1 }
 0x185   : > { %v2082_v55 = vadd.f32 %v3973_v30, %v5593_v54  ;;  %v5690_v43 = vpop.f32.mrf.mxu0 }
 0x186   : > { %v5692_v62 = vpop.f32.mrf.mxu1 }
 0x187   : > { %v5694_v24 = vadd.f32 %v4023_v46, %v2082_v55  ;;  %v4026_v38 = vpop.f32.mrf.mxu0 }
 0x188   : > { %v3976_v20 = vpop.f32.mrf.mxu1 }
 0x189   : > { %v2084_v10 = vadd.f32 %v3976_v20, %v5599_v56  ;;  %v5697_v34 = vpop.f32.mrf.mxu0 }
 0x18a   : > { %v5699_v0 = vpop.f32.mrf.mxu1 }
 0x18b   : > { %v5701_v49 = vadd.f32 %v4026_v38, %v2084_v10  ;;  %v4029_v26 = vpop.f32.mrf.mxu0 }
 0x18c   : > { %v3979_v47 = vpop.f32.mrf.mxu1 }
 0x18d   : > { %v2086_v54 = vadd.f32 %v3979_v47, %v5605_v53  ;;  %v5704_v27 = vpop.f32.mrf.mxu0 }
 0x18e   : > { %v5706_v9 = vpop.f32.mrf.mxu1 }
 0x18f   : > { %v5708_v33 = vadd.f32 %v4029_v26, %v2086_v54  ;;  %v4032_v28 = vpop.f32.mrf.mxu0 }
 0x190   : > { %v3982_v42 = vpop.f32.mrf.mxu1 }
 0x191   : > { %v2088_v56 = vadd.f32 %v3982_v42, %v5611_v48  ;;  %v5711_v36 = vpop.f32.mrf.mxu0 }
 0x192   : > { %v5713_v50 = vpop.f32.mrf.mxu1 }
 0x193   : > { %v5715_v3 = vadd.f32 %v4032_v28, %v2088_v56  ;;  %v4035_v22 = vpop.f32.mrf.mxu0 }
 0x194   : > { %v3985_v37 = vpop.f32.mrf.mxu1 }
 0x195   : > { %v2090_v53 = vadd.f32 %v3985_v37, %v5617_v40  ;;  %v5718_v8 = vpop.f32.mrf.mxu0 }
 0x196   : > { %v5720_v58 = vpop.f32.mrf.mxu1 }
 0x197   : > { %v5722_v61 = vadd.f32 %v4035_v22, %v2090_v53  ;;  %v4038_v1 = vpop.f32.mrf.mxu0 }
 0x198   : > { %v3988_v41 = vpop.f32.mrf.mxu1 }
 0x199   : > { %v2092_v48 = vadd.f32 %v3988_v41, %v5623_v23  ;;  %v5725_v4 = vpop.f32.mrf.mxu0 }
 0x19a   : > { %v5727_v46 = vpop.f32.mrf.mxu1 }
 0x19b   : > { %v5729_v30 = vadd.f32 %v4038_v1, %v2092_v48  ;;  %v4041_v55 = vpop.f32.mrf.mxu0 }
 0x19c   : > { %v3991_v38 = vpop.f32.mrf.mxu1 }
 0x19d   : > { %v2094_v40 = vadd.f32 %v3991_v38, %v5629_v6  ;;  %v5732_v20 = vpop.f32.mrf.mxu0 }
 0x19e   : > { %v5734_v10 = vpop.f32.mrf.mxu1 }
 0x19f   : > { %v5736_v26 = vadd.f32 %v4041_v55, %v2094_v40  ;;  %v4044_v47 = vpop.f32.mrf.mxu0 }
 0x1a0   : > { %v3994_v54 = vpop.f32.mrf.mxu1 }
 0x1a1   : > { %v2096_v23 = vadd.f32 %v3994_v54, %v5635_v25  ;;  %v5739_v28 = vpop.f32.mrf.mxu0 }
 0x1a2   : > { %v5741_v42 = vpop.f32.mrf.mxu1 }
 0x1a3   : > { %v5743_v56 = vadd.f32 %v4044_v47, %v2096_v23  ;;  %v4047_v22 = vpop.f32.mrf.mxu0 }
 0x1a4   : > { %v3997_v37 = vpop.f32.mrf.mxu1 }
 0x1a5   : > { %v2098_v6 = vadd.f32 %v3997_v37, %v5641_v14  ;;  %v5746_v53 = vpop.f32.mrf.mxu0 }
 0x1a6   : > { %v5748_v1 = vpop.f32.mrf.mxu1 }
 0x1a7   : > { %v5750_v41 = vadd.f32 %v4047_v22, %v2098_v6  ;;  %v4050_v48 = vpop.f32.mrf.mxu0 }
 0x1a8   : > { %v4000_v55 = vpop.f32.mrf.mxu1 }
 0x1a9   : > { %v2100_v25 = vadd.f32 %v4000_v55, %v5647_v2  ;;  %v5753_v38 = vpop.f32.mrf.mxu0 }
 0x1aa   : > { %v5755_v40 = vpop.f32.mrf.mxu1 }
 0x1ab   : > { %v5757_v47 = vadd.f32 %v4050_v48, %v2100_v25  ;;  %v4053_v54 = vpop.f32.mrf.mxu0 }
 0x1ac   : > { %v4003_v23 = vpop.f32.mrf.mxu1 }
 0x1ad   : > { %v2102_v14 = vadd.f32 %v4003_v23, %v5653_v44  ;;  %v5760_v37 = vpop.f32.mrf.mxu0 }
 0x1ae   : > { %6248 = vst [vmem:[#allocation45_spill] sm:$0xff] %v5760_v37  ;;  %v5762_v60 = vpop.f32.mrf.mxu1 }
 0x1af   : > { %v5764_v22 = vadd.f32 %v4053_v54, %v2102_v14  ;;  %v4056_v6 = vpop.f32.mrf.mxu0 }
 0x1b0   : > { %v4006_v45 = vpop.f32.mrf.mxu1 }
 0x1b1   : > { %6249 = vst [vmem:[#allocation46_spill] sm:$0xff] %v5764_v22  ;;  %v2104_v2 = vadd.f32 %v4006_v45, %v5659_v29  ;;  %v5767_v55 = vpop.f32.mrf.mxu0 }
 0x1b2   : > { %6250 = vst [vmem:[#allocation47_spill] sm:$0xff] %v5767_v55  ;;  %v5769_v15 = vpop.f32.mrf.mxu1 }
 0x1b3   : > { %v5771_v48 = vadd.f32 %v4056_v6, %v2104_v2  ;;  %v4059_v25 = vpop.f32.mrf.mxu0 }
 0x1b4   : > { %v4009_v63 = vpop.f32.mrf.mxu1 }
 0x1b5   : > { %6251 = vst [vmem:[#allocation19_spill] sm:$0xff] %v5771_v48  ;;  %v2106_v44 = vadd.f32 %v4009_v63, %v5665_v13  ;;  %v5774_v23 = vpop.f32.mrf.mxu0  ;;  %v2079_v63 = vadd.f32 %v5685_v31, %v5590_v59 }
 0x1b6   : > { %6252 = vst [vmem:[#allocation24_spill] sm:$0xff] %v5774_v23  ;;  %v5776_v37 = vpop.f32.mrf.mxu1 }
 0x1b7   : > { %v5778_v54 = vadd.f32 %v4059_v25, %v2106_v44  ;;  %v4062_v14 = vpop.f32.mrf.mxu0 }
 0x1b8   : > { %v4012_v22 = vpop.f32.mrf.mxu1 }
 0x1b9   : > { %6253 = vst [vmem:[#allocation27_spill] sm:$0xff] %v5778_v54  ;;  %v2108_v29 = vadd.f32 %v4012_v22, %v5671_v35  ;;  %v5781_v45 = vpop.f32.mrf.mxu0 }
 0x1ba   : > { %6254 = vst [vmem:[#allocation29_spill] sm:$0xff] %v5781_v45  ;;  %v5783_v55 = vpop.f32.mrf.mxu1  ;;  %v2342_v45 = vadd.f32 %v5683_v39, %v2079_v63 }
 0x1bb   : > { %v5785_v6 = vadd.f32 %v4062_v14, %v2108_v29  ;;  %v4065_v2 = vpop.f32.mrf.mxu0  ;;  %v2081_v14 = vadd.f32 %v5692_v62, %v5596_v7 }
 0x1bc   : > { %v4015_v48 = vpop.f32.mrf.mxu1 }
 0x1bd   : > { %6255 = vst [vmem:[#allocation31_spill] sm:$0xff] %v5785_v6  ;;  %v2110_v13 = vadd.f32 %v4015_v48, %v5677_v51  ;;  %v5790_v23 = vpop.f32.mrf.mxu0  ;;  %v2344_v48 = vadd.f32 %v5690_v43, %v2081_v14 }
 0x1be   : > { %6256 = vst [vmem:[#allocation33_spill] sm:$0xff] %v5790_v23  ;;  %v5792_v25 = vpop.f32.mrf.mxu1 }
 0x1bf   : > { %6257 = vst [vmem:[#allocation35_spill] sm:$0xff] %v5792_v25  ;;  %v5794_v44 = vadd.f32 %v4065_v2, %v2110_v13  ;;  %v4120_v35 = vpop.f32.mrf.mxu0  ;;  %v2083_v2 = vadd.f32 %v5699_v0, %v5602_v18 }
 0x1c0   : > { %v4070_v22 = vpop.f32.mrf.mxu1 }
 0x1c1   : > { %6258 = vst [vmem:[#allocation5_spill] sm:$0xff] %v5794_v44  ;;  %v2716_v29 = vpop.f32.mrf.mxu0  ;;  %v2610_v54 = vadd.f32 %v4070_v22, %v5687_v57  ;;  %v2346_v57 = vadd.f32 %v5697_v34, %v2083_v2 }
 0x1c2   : > { %v2450_v6 = vpop.f32.mrf.mxu1 }
 0x1c3   : > { %v2609_v59 = vadd.f32 %v2450_v6, %v2342_v45  ;;  %v4123_v31 = vpop.f32.mrf.mxu0  ;;  %v5805_v39 = vadd.f32 %v4120_v35, %v2610_v54  ;;  %v2085_v45 = vadd.f32 %v5706_v9, %v5608_v12  ;;  %v2087_v12 = vadd.f32 %v5713_v50, %v5614_v32 }
 0x1c4   : > { %v4073_v51 = vpop.f32.mrf.mxu1  ;;  %v2089_v32 = vadd.f32 %v5720_v58, %v5620_v17  ;;  %v2091_v17 = vadd.f32 %v5727_v46, %v5626_v52  ;;  %v2093_v52 = vadd.f32 %v5734_v10, %v5632_v16  ;;  %v2095_v16 = vadd.f32 %v5741_v42, %v5638_v11 }
 0x1c5   : > { %v5803_v13 = vadd.f32 %v2716_v29, %v2609_v59  ;;  %v2726_v44 = vpop.f32.mrf.mxu0  ;;  %v2612_v7 = vadd.f32 %v4073_v51, %v5694_v24  ;;  %v2348_v34 = vadd.f32 %v5704_v27, %v2085_v45  ;;  %v2350_v27 = vadd.f32 %v5711_v36, %v2087_v12 }
 0x1c6   : > { %v2460_v23 = vpop.f32.mrf.mxu1  ;;  %v2352_v36 = vadd.f32 %v5718_v8, %v2089_v32  ;;  %v2354_v8 = vadd.f32 %v5725_v4, %v2091_v17  ;;  %v2356_v4 = vadd.f32 %v5732_v20, %v2093_v52  ;;  %v2358_v20 = vadd.f32 %v5739_v28, %v2095_v16 }
 0x1c7   : > { %v2611_v62 = vadd.f32 %v2460_v23, %v2344_v48  ;;  %v4126_v63 = vpop.f32.mrf.mxu0  ;;  %v2907_v43 = vadd.f32 %v5805_v39, %v5803_v13  ;;  %v5815_v22 = vadd.f32 %v4123_v31, %v2612_v7  ;;  %v2097_v11 = vadd.f32 %v5748_v1, %v5644_v21 }
 0x1c8   : > { %v4076_v25 = vpop.f32.mrf.mxu1  ;;  %v2099_v21 = vadd.f32 %v5755_v40, %v5650_v5  ;;  %v2101_v5 = vadd.f32 %v5762_v60, %v5656_v19 }
 0x1c9   : > { %v5813_v18 = vadd.f32 %v2726_v44, %v2611_v62  ;;  %v2736_v0 = vpop.f32.mrf.mxu0  ;;  %v2614_v24 = vadd.f32 %v4076_v25, %v5701_v49  ;;  %v2360_v28 = vadd.f32 %v5746_v53, %v2097_v11 }
 0x1ca   : > { %v2470_v6 = vpop.f32.mrf.mxu1  ;;  %v2362_v53 = vadd.f32 %v5753_v38, %v2099_v21 }
 0x1cb   : > { %v2908_v54 = vadd.f32 %v2907_v43, %v5813_v18  ;;  %v2613_v23 = vadd.f32 %v2470_v6, %v2346_v57  ;;  %v4129_v35 = vpop.f32.mrf.mxu0  ;;  %v5825_v31 = vadd.f32 %v4126_v63, %v2614_v24 }
 0x1cc   : > { %v4079_v14 = vpop.f32.mrf.mxu1 }
 0x1cd   : > { %v5822_v9 = vadd.f32 %v2736_v0, %v2613_v23  ;;  %v2909_v44 = vadd.f32 %v2908_v54, %v5815_v22  ;;  %v2746_v29 = vpop.f32.mrf.mxu0  ;;  %v2616_v49 = vadd.f32 %v4079_v14, %v5708_v33 }
 0x1ce   : > { %v2480_v59 = vpop.f32.mrf.mxu1 }
 0x1cf   : > { %v2910_v51 = vadd.f32 %v2909_v44, %v5822_v9  ;;  %v2615_v25 = vadd.f32 %v2480_v59, %v2348_v34  ;;  %v4132_v48 = vpop.f32.mrf.mxu0  ;;  %v5835_v63 = vadd.f32 %v4129_v35, %v2616_v49 }
 0x1d0   : > { %v4082_v2 = vpop.f32.mrf.mxu1 }
 0x1d1   : > { %v5832_v50 = vadd.f32 %v2746_v29, %v2615_v25  ;;  %v2911_v7 = vadd.f32 %v2910_v51, %v5825_v31  ;;  %v2756_v62 = vpop.f32.mrf.mxu0  ;;  %v2618_v33 = vadd.f32 %v4082_v2, %v5715_v3 }
 0x1d2   : > { %v2490_v57 = vpop.f32.mrf.mxu1 }
 0x1d3   : > { %v2912_v45 = vadd.f32 %v2911_v7, %v5832_v50  ;;  %v2617_v43 = vadd.f32 %v2490_v57, %v2350_v27  ;;  %v4135_v0 = vpop.f32.mrf.mxu0  ;;  %v5845_v35 = vadd.f32 %v4132_v48, %v2618_v33 }
 0x1d4   : > { %v4085_v6 = vpop.f32.mrf.mxu1 }
 0x1d5   : > { %v5842_v58 = vadd.f32 %v2756_v62, %v2617_v43  ;;  %v2913_v54 = vadd.f32 %v2912_v45, %v5835_v63  ;;  %v2766_v24 = vpop.f32.mrf.mxu0  ;;  %v2620_v3 = vadd.f32 %v4085_v6, %v5722_v61 }
 0x1d6   : > { %v2500_v23 = vpop.f32.mrf.mxu1 }
 0x1d7   : > { %v2914_v14 = vadd.f32 %v2913_v54, %v5842_v58  ;;  %v2619_v34 = vadd.f32 %v2500_v23, %v2352_v36  ;;  %v4138_v12 = vpop.f32.mrf.mxu0  ;;  %v5855_v49 = vadd.f32 %v4135_v0, %v2620_v3 }
 0x1d8   : > { %v4088_v44 = vpop.f32.mrf.mxu1 }
 0x1d9   : > { %v5852_v46 = vadd.f32 %v2766_v24, %v2619_v34  ;;  %v2915_v29 = vadd.f32 %v2914_v14, %v5845_v35  ;;  %v2776_v59 = vpop.f32.mrf.mxu0  ;;  %v2622_v61 = vadd.f32 %v4088_v44, %v5729_v30 }
 0x1da   : > { %v2510_v51 = vpop.f32.mrf.mxu1 }
 0x1db   : > { %v2916_v25 = vadd.f32 %v2915_v29, %v5852_v46  ;;  %v2621_v48 = vadd.f32 %v2510_v51, %v2354_v8  ;;  %v4141_v2 = vpop.f32.mrf.mxu0  ;;  %v5865_v57 = vadd.f32 %v4138_v12, %v2622_v61 }
 0x1dc   : > { %v4091_v27 = vpop.f32.mrf.mxu1 }
 0x1dd   : > { %v5862_v10 = vadd.f32 %v2776_v59, %v2621_v48  ;;  %v2917_v32 = vadd.f32 %v2916_v25, %v5855_v49  ;;  %v2786_v7 = vpop.f32.mrf.mxu0  ;;  %v2624_v30 = vadd.f32 %v4091_v27, %v5736_v26 }
 0x1de   : > { %v2520_v62 = vpop.f32.mrf.mxu1 }
 0x1df   : > { %v2918_v45 = vadd.f32 %v2917_v32, %v5862_v10  ;;  %v2623_v33 = vadd.f32 %v2520_v62, %v2356_v4  ;;  %v4144_v43 = vpop.f32.mrf.mxu0  ;;  %v5875_v54 = vadd.f32 %v4141_v2, %v2624_v30  ;;  %v6260_v62 = vld [vmem:[#allocation41_spill] sm:$0xff] }
 0x1e0   : > { %v4094_v0 = vpop.f32.mrf.mxu1  ;;  %v2103_v19 = vadd.f32 %v5769_v15, %v6260_v62  ;;  %v6268_v62 = vld [vmem:[#allocation29_spill] sm:$0xff] }
 0x1e1   : > { %v5872_v42 = vadd.f32 %v2786_v7, %v2623_v33  ;;  %v2919_v6 = vadd.f32 %v2918_v45, %v5865_v57  ;;  %v2796_v36 = vpop.f32.mrf.mxu0  ;;  %v2626_v26 = vadd.f32 %v4094_v0, %v5743_v56  ;;  %v6259_v7 = vld [vmem:[#allocation45_spill] sm:$0xff] }
 0x1e2   : > { %v2530_v17 = vpop.f32.mrf.mxu1  ;;  %v2364_v38 = vadd.f32 %v6259_v7, %v2101_v5 }
 0x1e3   : > { %v2920_v24 = vadd.f32 %v2919_v6, %v5872_v42  ;;  %v2625_v23 = vadd.f32 %v2530_v17, %v2358_v20  ;;  %v4147_v14 = vpop.f32.mrf.mxu0  ;;  %v5885_v8 = vadd.f32 %v4144_v43, %v2626_v26  ;;  %v6261_v20 = vld [vmem:[#allocation46_spill] sm:$0xff]  ;;  %v6262_v17 = vld [vmem:[#allocation47_spill] sm:$0xff] }
 0x1e4   : > { %v4097_v3 = vpop.f32.mrf.mxu1  ;;  %v6263_v26 = vld [vmem:[#allocation42_spill] sm:$0xff] }
 0x1e5   : > { %v5882_v1 = vadd.f32 %v2796_v36, %v2625_v23  ;;  %v2921_v34 = vadd.f32 %v2920_v24, %v5875_v54  ;;  %v2806_v12 = vpop.f32.mrf.mxu0  ;;  %v2628_v56 = vadd.f32 %v4097_v3, %v5750_v41  ;;  %v2366_v24 = vadd.f32 %v6262_v17, %v2103_v19  ;;  %v6271_v17 = vld [vmem:[#allocation31_spill] sm:$0xff] }
 0x1e6   : > { %v2540_v44 = vpop.f32.mrf.mxu1  ;;  %v2105_v15 = vadd.f32 %v5776_v37, %v6263_v26 }
 0x1e7   : > { %v2922_v52 = vadd.f32 %v2921_v34, %v5882_v1  ;;  %v2627_v29 = vadd.f32 %v2540_v44, %v2360_v28  ;;  %v4150_v59 = vpop.f32.mrf.mxu0  ;;  %v5895_v2 = vadd.f32 %v4147_v14, %v2628_v56 }
 0x1e8   : > { %v4100_v51 = vpop.f32.mrf.mxu1 }
 0x1e9   : > { %v5892_v40 = vadd.f32 %v2806_v12, %v2627_v29  ;;  %v2923_v25 = vadd.f32 %v2922_v52, %v5885_v8  ;;  %v2816_v61 = vpop.f32.mrf.mxu0  ;;  %v2630_v41 = vadd.f32 %v4100_v51, %v5757_v47  ;;  %v6264_v12 = vld [vmem:[#allocation19_spill] sm:$0xff] }
 0x1ea   : > { %v2550_v48 = vpop.f32.mrf.mxu1 }
 0x1eb   : > { %v2924_v27 = vadd.f32 %v2923_v25, %v5892_v40  ;;  %v2629_v4 = vadd.f32 %v2550_v48, %v2362_v53  ;;  %v4153_v16 = vpop.f32.mrf.mxu0  ;;  %v5905_v43 = vadd.f32 %v4150_v59, %v2630_v41  ;;  %v6265_v59 = vld [vmem:[#allocation24_spill] sm:$0xff]  ;;  %v6266_v53 = vld [vmem:[#allocation43_spill] sm:$0xff] }
 0x1ec   : > { %v4103_v32 = vpop.f32.mrf.mxu1  ;;  %v2368_v51 = vadd.f32 %v6265_v59, %v2105_v15  ;;  %v2107_v37 = vadd.f32 %v5783_v55, %v6266_v53 }
 0x1ed   : > { %v5902_v60 = vadd.f32 %v2816_v61, %v2629_v4  ;;  %v2925_v45 = vadd.f32 %v2924_v27, %v5895_v2  ;;  %v2826_v30 = vpop.f32.mrf.mxu0  ;;  %v2632_v47 = vadd.f32 %v4103_v32, %v6261_v20  ;;  %v6267_v4 = vld [vmem:[#allocation27_spill] sm:$0xff] }
 0x1ee   : > { %v2560_v33 = vpop.f32.mrf.mxu1  ;;  %v2370_v19 = vadd.f32 %v6268_v62, %v2107_v37 }
 0x1ef   : > { %v2926_v0 = vadd.f32 %v2925_v45, %v5902_v60  ;;  %v2631_v11 = vadd.f32 %v2560_v33, %v2364_v38  ;;  %v4156_v6 = vpop.f32.mrf.mxu0  ;;  %v5915_v21 = vadd.f32 %v4153_v16, %v2632_v47  ;;  %v6269_v45 = vld [vmem:[#allocation44_spill] sm:$0xff] }
 0x1f0   : > { %v4106_v36 = vpop.f32.mrf.mxu1 }
 0x1f1   : > { %v5912_v23 = vadd.f32 %v2826_v30, %v2631_v11  ;;  %v2927_v14 = vadd.f32 %v2926_v0, %v5905_v43  ;;  %v2836_v3 = vpop.f32.mrf.mxu0  ;;  %v2634_v44 = vadd.f32 %v4106_v36, %v6264_v12  ;;  %v6270_v30 = vld [vmem:[#allocation35_spill] sm:$0xff] }
 0x1f2   : > { %v2570_v28 = vpop.f32.mrf.mxu1  ;;  %v2109_v33 = vadd.f32 %v6270_v30, %v6269_v45 }
 0x1f3   : > { %v2928_v34 = vadd.f32 %v2927_v14, %v5912_v23  ;;  %v2633_v52 = vadd.f32 %v2570_v28, %v2366_v24  ;;  %v4159_v56 = vpop.f32.mrf.mxu0  ;;  %v2900_v27 = vadd.f32 %v4156_v6, %v2634_v44  ;;  %v6272_v14 = vld [vmem:[#allocation33_spill] sm:$0xff] }
 0x1f4   : > { %v4109_v29 = vpop.f32.mrf.mxu1 }
 0x1f5   : > { %v5922_v5 = vadd.f32 %v2836_v3, %v2633_v52  ;;  %v2929_v25 = vadd.f32 %v2928_v34, %v5915_v21  ;;  %v2846_v61 = vpop.f32.mrf.mxu0  ;;  %v2636_v16 = vadd.f32 %v4109_v29, %v6267_v4  ;;  %v2372_v3 = vadd.f32 %v6272_v14, %v2109_v33  ;;  %v6273_v29 = vld [vmem:[#allocation5_spill] sm:$0xff] }
 0x1f6   : > { %v2580_v48 = vpop.f32.mrf.mxu1 }
 0x1f7   : > { %v2930_v41 = vadd.f32 %v2929_v25, %v5922_v5  ;;  %v2635_v32 = vadd.f32 %v2580_v48, %v2368_v51  ;;  %v4162_v7 = vpop.f32.mrf.mxu0  ;;  %v2902_v11 = vadd.f32 %v4159_v56, %v2636_v16 }
 0x1f8   : > { %v4112_v38 = vpop.f32.mrf.mxu1 }
 0x1f9   : > { %v2901_v55 = vadd.f32 %v2846_v61, %v2635_v32  ;;  %v2931_v0 = vadd.f32 %v2930_v41, %v2900_v27  ;;  %v2856_v20 = vpop.f32.mrf.mxu0  ;;  %v2638_v6 = vadd.f32 %v4112_v38, %v6271_v17 }
 0x1fa   : > { %v2590_v47 = vpop.f32.mrf.mxu1 }
 0x1fb   : > { %v2932_v36 = vadd.f32 %v2931_v0, %v2901_v55  ;;  %v2637_v24 = vadd.f32 %v2590_v47, %v2370_v19  ;;  %v4165_v15 = vpop.f32.mrf.mxu0  ;;  %v2904_v44 = vadd.f32 %v4162_v7, %v2638_v6 }
 0x1fc   : > { %v4115_v26 = vpop.f32.mrf.mxu1 }
 0x1fd   : > { %v2903_v28 = vadd.f32 %v2856_v20, %v2637_v24  ;;  %v2933_v34 = vadd.f32 %v2932_v36, %v2902_v11  ;;  %v2640_v59 = vadd.f32 %v4115_v26, %v6273_v29  ;;  %v2866_v53 = vpop.f32.mrf.mxu0 }
 0x1fe   : > { %v2600_v12 = vpop.f32.mrf.mxu1 }
 0x1ff   : > { %v2934_v52 = vadd.f32 %v2933_v34, %v2903_v28  ;;  %v2639_v51 = vadd.f32 %v2600_v12, %v2372_v3  ;;  %v2906_v25 = vadd.f32 %v4165_v15, %v2640_v59 }
 0x201   : > { %v2905_v56 = vadd.f32 %v2866_v53, %v2639_v51  ;;  %v2935_v37 = vadd.f32 %v2934_v52, %v2904_v44 }
 0x203   : > { %v2936_v61 = vadd.f32 %v2935_v37, %v2905_v56 }
 0x205   : > { %v2937_v48 = vadd.f32 %v2936_v61, %v2906_v25 }
 0x207   : > { %v2938_v41 = vrot.slane %v2937_v48, 4 }
 0x209   : > { %v2939_v4 = vadd.f32 %v2938_v41, %v2937_v48 }
 0x20b   : > { %v2940_v16 = vrot.slane %v2939_v4, 2 }
 0x20d   : > { %v2941_v32 = vadd.f32 %v2940_v16, %v2939_v4 }
 0x20f   : > { %v2942_v38 = vrot.slane %v2941_v32, 1 }
 0x211   : > { %v2943_v7 = vadd.f32 %v2942_v38, %v2941_v32 }
 0x213   : > { %v2944_v62 = vmul.f32 0.00390625, %v2943_v7 }
 0x215   : > { %3046 = vst [vmem:[%s5936_s27] sm:$0x1] %v2944_v62  ;;  %v2953_v19 = vsub.f32 %v5842_v58, %v2944_v62  ;;  %v2954_v45 = vsub.f32 %v5845_v35, %v2944_v62  ;;  %v2955_v30 = vsub.f32 %v5852_v46, %v2944_v62  ;;  %v2956_v33 = vsub.f32 %v5855_v49, %v2944_v62 }
 0x216   : > { %v2957_v0 = vsub.f32 %v5862_v10, %v2944_v62  ;;  %v2958_v20 = vsub.f32 %v5865_v57, %v2944_v62  ;;  %v2959_v47 = vsub.f32 %v5872_v42, %v2944_v62  ;;  %v2960_v36 = vsub.f32 %v5875_v54, %v2944_v62 }
 0x217   : > { %v2961_v17 = vsub.f32 %v5882_v1, %v2944_v62  ;;  %v2962_v6 = vsub.f32 %v5885_v8, %v2944_v62  ;;  %v2963_v58 = vsub.f32 %v5892_v40, %v2944_v62  ;;  %v2964_v35 = vsub.f32 %v5895_v2, %v2944_v62 }
 0x218   : > { %v2965_v46 = vsub.f32 %v5902_v60, %v2944_v62  ;;  %v2966_v49 = vsub.f32 %v5905_v43, %v2944_v62  ;;  %v2967_v10 = vsub.f32 %v5912_v23, %v2944_v62  ;;  %v2968_v57 = vsub.f32 %v5915_v21, %v2944_v62 }
 0x219   : > { %v2969_v42 = vsub.f32 %v5922_v5, %v2944_v62  ;;  %v5956_v24 = vsub.f32 %v2900_v27, %v2944_v62  ;;  %v5958_v54 = vsub.f32 %v2901_v55, %v2944_v62  ;;  %v5960_v1 = vsub.f32 %v2902_v11, %v2944_v62 }
 0x21a   : > { %v5962_v8 = vsub.f32 %v2903_v28, %v2944_v62  ;;  %v5964_v40 = vsub.f32 %v2904_v44, %v2944_v62  ;;  %v5966_v2 = vsub.f32 %v2905_v56, %v2944_v62  ;;  %v5968_v60 = vsub.f32 %v2906_v25, %v2944_v62 }
 0x21b   : > { %v2945_v43 = vsub.f32 %v5803_v13, %v2944_v62  ;;  %v2946_v23 = vsub.f32 %v5805_v39, %v2944_v62  ;;  %v2947_v21 = vsub.f32 %v5813_v18, %v2944_v62  ;;  %v2948_v55 = vsub.f32 %v5815_v22, %v2944_v62 }
 0x21c   : > { %v2949_v11 = vsub.f32 %v5822_v9, %v2944_v62  ;;  %v2950_v14 = vsub.f32 %v5825_v31, %v2944_v62  ;;  %v2951_v34 = vsub.f32 %v5832_v50, %v2944_v62  ;;  %v2952_v39 = vsub.f32 %v5835_v63, %v2944_v62 }
 0x21d   : > { %v2977_v5 = vmul.f32 %v2945_v43, %v2945_v43  ;;  %v2978_v27 = vmul.f32 %v2946_v23, %v2946_v23  ;;  %v2979_v26 = vmul.f32 %v2947_v21, %v2947_v21  ;;  %v2980_v3 = vmul.f32 %v2948_v55, %v2948_v55 }
 0x21e   : > { %v2981_v12 = vmul.f32 %v2949_v11, %v2949_v11  ;;  %v2982_v44 = vmul.f32 %v2950_v14, %v2950_v14  ;;  %v2983_v52 = vmul.f32 %v2951_v34, %v2951_v34  ;;  %v2984_v59 = vmul.f32 %v2952_v39, %v2952_v39 }
 0x21f   : > { %v3009_v15 = vadd.f32 %v2978_v27, %v2977_v5  ;;  %v2985_v51 = vmul.f32 %v2953_v19, %v2953_v19  ;;  %v2986_v53 = vmul.f32 %v2954_v45, %v2954_v45  ;;  %v2987_v37 = vmul.f32 %v2955_v30, %v2955_v30 }
 0x220   : > { %v2988_v25 = vmul.f32 %v2956_v33, %v2956_v33  ;;  %v2989_v48 = vmul.f32 %v2957_v0, %v2957_v0  ;;  %v2990_v41 = vmul.f32 %v2958_v20, %v2958_v20  ;;  %v2991_v16 = vmul.f32 %v2959_v47, %v2959_v47 }
 0x221   : > { %v3010_v28 = vadd.f32 %v3009_v15, %v2979_v26  ;;  %v2992_v32 = vmul.f32 %v2960_v36, %v2960_v36  ;;  %v2993_v7 = vmul.f32 %v2961_v17, %v2961_v17  ;;  %v2994_v43 = vmul.f32 %v2962_v6, %v2962_v6 }
 0x222   : > { %v2995_v19 = vmul.f32 %v2963_v58, %v2963_v58  ;;  %v2996_v45 = vmul.f32 %v2964_v35, %v2964_v35  ;;  %v2997_v30 = vmul.f32 %v2965_v46, %v2965_v46  ;;  %v2998_v33 = vmul.f32 %v2966_v49, %v2966_v49 }
 0x223   : > { %v3011_v13 = vadd.f32 %v3010_v28, %v2980_v3  ;;  %v2999_v0 = vmul.f32 %v2967_v10, %v2967_v10  ;;  %v3000_v20 = vmul.f32 %v2968_v57, %v2968_v57  ;;  %v3001_v47 = vmul.f32 %v2969_v42, %v2969_v42 }
 0x224   : > { %v3002_v36 = vmul.f32 %v5956_v24, %v5956_v24  ;;  %v3003_v6 = vmul.f32 %v5958_v54, %v5958_v54  ;;  %v3004_v35 = vmul.f32 %v5960_v1, %v5960_v1  ;;  %v3005_v49 = vmul.f32 %v5962_v8, %v5962_v8 }
 0x225   : > { %v3012_v18 = vadd.f32 %v3011_v13, %v2981_v12  ;;  %v3006_v57 = vmul.f32 %v5964_v40, %v5964_v40  ;;  %v3007_v24 = vmul.f32 %v5966_v2, %v5966_v2  ;;  %v3008_v14 = vmul.f32 %v5968_v60, %v5968_v60 }
 0x227   : > { %v3013_v29 = vadd.f32 %v3012_v18, %v2982_v44 }
 0x229   : > { %v3014_v22 = vadd.f32 %v3013_v29, %v2983_v52 }
 0x22b   : > { %v3015_v9 = vadd.f32 %v3014_v22, %v2984_v59 }
 0x22d   : > { %v3016_v56 = vadd.f32 %v3015_v9, %v2985_v51 }
 0x22f   : > { %v3017_v31 = vadd.f32 %v3016_v56, %v2986_v53 }
 0x231   : > { %v3018_v61 = vadd.f32 %v3017_v31, %v2987_v37 }
 0x233   : > { %v3019_v50 = vadd.f32 %v3018_v61, %v2988_v25 }
 0x235   : > { %v3020_v4 = vadd.f32 %v3019_v50, %v2989_v48 }
 0x237   : > { %v3021_v63 = vadd.f32 %v3020_v4, %v2990_v41 }
 0x239   : > { %v3022_v38 = vadd.f32 %v3021_v63, %v2991_v16 }
 0x23b   : > { %v3023_v62 = vadd.f32 %v3022_v38, %v2992_v32 }
 0x23d   : > { %v3024_v23 = vadd.f32 %v3023_v62, %v2993_v7 }
 0x23f   : > { %v3025_v21 = vadd.f32 %v3024_v23, %v2994_v43 }
 0x241   : > { %v3026_v5 = vadd.f32 %v3025_v21, %v2995_v19 }
 0x243   : > { %v3027_v27 = vadd.f32 %v3026_v5, %v2996_v45 }
 0x245   : > { %v3028_v55 = vadd.f32 %v3027_v27, %v2997_v30 }
 0x247   : > { %v3029_v11 = vadd.f32 %v3028_v55, %v2998_v33 }
 0x249   : > { %v3030_v26 = vadd.f32 %v3029_v11, %v2999_v0 }
 0x24b   : > { %v3031_v15 = vadd.f32 %v3030_v26, %v3000_v20 }
 0x24d   : > { %v3032_v17 = vadd.f32 %v3031_v15, %v3001_v47 }
 0x24f   : > { %v3033_v58 = vadd.f32 %v3032_v17, %v3002_v36 }
 0x251   : > { %v3034_v46 = vadd.f32 %v3033_v58, %v3003_v6 }
 0x253   : > { %v3035_v10 = vadd.f32 %v3034_v46, %v3004_v35 }
 0x255   : > { %v3036_v42 = vadd.f32 %v3035_v10, %v3005_v49 }
 0x257   : > { %v3037_v54 = vadd.f32 %v3036_v42, %v3006_v57 }
 0x259   : > { %v3038_v1 = vadd.f32 %v3037_v54, %v3007_v24 }
 0x25b   : > { %v3039_v3 = vadd.f32 %v3038_v1, %v3008_v14 }
 0x25d   : > { %v3040_v28 = vrot.slane %v3039_v3, 4 }
 0x25f   : > { %v3041_v34 = vadd.f32 %v3040_v28, %v3039_v3 }
 0x261   : > { %v3042_v8 = vrot.slane %v3041_v34, 2 }
 0x263   : > { %v3043_v12 = vadd.f32 %v3042_v8, %v3041_v34 }
 0x265   : > { %v3044_v40 = vrot.slane %v3043_v12, 1 }
 0x267   : > { %v3045_v13 = vadd.f32 %v3044_v40, %v3043_v12 }
 0x269   : > { %3047 = vst [vmem:[%s5936_s27 + $0x1] sm:$0x1] %v3045_v13 }
 0x26a   : > { %4221 = shalt.err (!%p4218_p3)
}
 0x26b   : > { %s4222_s14 = scalar_lea.hbm %s3060_s4, 32  ;;  %s4226_s21 = scalar_lea.hbm %s6031_s2, 64 }
 0x26c   : > { %p4223_p4 = scmp.ne.s32.totalorder %s3060_s4, %s4222_s14  ;;  %p4227_p9 = scmp.lt.s32.totalorder %s3060_s4, %s6031_s2 }
 0x26d   : > { %p4228_p10 = scmp.lt.s32.totalorder %s4226_s21, %s4222_s14 }
 0x26e   : > { %p4224_p7 = pnand %p4223_p4, %p4324_p5 }
 0x26f   : > { %p4229_p11 = por %p4228_p10, %p4227_p9 }
 0x270   : > { %p4225_p8 = pneg %p4224_p7 }
 0x272   : > { %p4230_p12 = pnand %p4229_p11, %p4225_p8 }
 0x274   : > { %4233 = shalt.err (!%p4230_p12)
}
 0x275   : > { %4169 = dma.vmem_to_hbm [thread:$0]  (%p4324_p5), %s3063_s29, 32, %s3060_s4, %s3049_s5  }
 0x276 PF: > { %p4175_p13 = scmp.ge.s32.totalorder %s4268_s12, 2  ;;  %s3074_s24 = sand.u32 1, %s4256_s9  }
 0x277   : > { %s3075_s25 = scalar_lea.sflag [#allocation3], %s3074_s24 }
 0x278   : > { %p4172_p0 = pnand %p4175_p13, %p4328_p6 }
 0x27a   : > { %p4173_p1 = pneg %p4172_p0 }
 0x27c   : > { %4251 = dma.done.wait (%p4173_p1), %s3075_s25, 32  }
 0x27d   : > { %4253 = vsyncadd (%p4173_p1), %s3075_s25, 4294967264  ;;  %p12_p2 = scmp.ge.s32.totalorder %s4311_s15, 4   ;;  %s6274_s9 = smov %s4260_s10 }
 0x27e   : > { %s6275_s10 = smov %s4264_s11  ;;  %s6276_s11 = smov %s4322_s18 }
 0x27f   : > { %s6277_s12 = smov %s4311_s15  ;;  %14 = sbr.rel (!%p12_p2) target bundleno = 3 (0x3), region = 63 }
 0x284   :  { %3080 = vsyncpa [#allocation3], 1 }
 0x285   :  { %3082 = vsyncpa [#allocation3 + $0x1], 1 }

</bundles_post_ra>
